<compile_context>
chip_gen: v7x
topology: tpu7x:2x2x1
jax: 0.10.0
libtpu: 0.0.40
codegen_flags: <defaults>
</compile_context>

<pallas_src>
import math

import jax
import jax.numpy as jnp
from jax import lax
from jax.experimental import pallas as pl
from jax.experimental.pallas import tpu as pltpu

# ---------------- model hyper-parameters (small, consistent with the module) ----------
VOCAB = 50
D_MODEL = 32
MAX_LEN = 16
N_LAYERS = 2
HEAD = 4
DK = D_MODEL // HEAD
D_FF = 64
BATCH = 2
SEQ = 8
EPS = 1e-5          # nn.LayerNorm default
NEG = -1e9          # masked_fill value


# ---------------- Pallas kernel: full encoder stack ------------------------------------
def encoder_stack_kernel(
    x_ref,        # [M, D]      f32   input activations (M = B*S)
    bias_ref,     # [H*M, M]    f32   additive attention bias (0 / -1e9), head-stacked
    hmask_ref,    # [H*M, D]    bf16  0/1 head-lane mask (row block h keeps lanes h*dk..)
    wqkv_ref,     # [L, D, 3D]  bf16  fused Wq|Wk|Wv (1/sqrt(dk) folded into Wq)
    bqkv_ref,     # [L, 1, 3D]  f32   fused bq|bk|bv (1/sqrt(dk) folded into bq)
    wo_ref,       # [L, D, D]   bf16
    w1_ref,       # [L, D, Dff] bf16
    b1_ref,       # [L, 1, Dff] f32
    w2_ref,       # [L, Dff, D] bf16
    vec_ref,      # [L, 6, D]   f32   rows: bo, ln1_g, ln1_b, b2, ln2_g, ln2_b
    out_ref,      # [M, D]      f32
):
    f32 = jnp.float32
    bf16 = jnp.bfloat16
    D = D_MODEL
    M = x_ref.shape[0]

    x = x_ref[...].astype(f32)            # [M, D]
    bias = bias_ref[...]                  # [H*M, M]
    hmask = hmask_ref[...]                # [H*M, D] bf16

    def layer_norm(v, g, b):
        mu = jnp.mean(v, axis=-1, keepdims=True)
        var = jnp.mean((v - mu) ** 2, axis=-1, keepdims=True)
        return (v - mu) * lax.rsqrt(var + EPS) * g + b

    for l in range(N_LAYERS):
        vecs = vec_ref[l]                                   # [6, D] f32
        bo, g1, b1n, b2, g2, b2n = (vecs[i:i + 1, :] for i in range(6))

        # ------------- multi-head self-attention (head-batched) -----------------------
        residual = x
        x_bf = x.astype(bf16)

        # fused Q|K|V projection: one MXU push
        qkv = jnp.dot(x_bf, wqkv_ref[l], preferred_element_type=f32) + bqkv_ref[l]
        q = qkv[:, 0:D].astype(bf16)                        # scale already folded in
        k = qkv[:, D:2 * D].astype(bf16)
        v = qkv[:, 2 * D:3 * D].astype(bf16)

        # stack query heads along M; head-lane mask zeros lanes of other heads, so the
        # single [H*M, D] x [D, M] matmul yields exact per-head scores in row blocks.
        q_stack = jnp.concatenate([q] * HEAD, axis=0) * hmask          # [H*M, D]

        s = lax.dot_general(q_stack, k, (((1,), (1,)), ((), ())),
                            preferred_element_type=f32)                # [H*M, M]
        s = s + bias
        m = jnp.max(s, axis=-1, keepdims=True)
        p = jnp.exp(s - m)
        p = p * pl.reciprocal(jnp.sum(p, axis=-1, keepdims=True), approx=True)

        # context against full V; own-head lanes are the valid ones, mask the rest
        ctx = jnp.dot(p.astype(bf16), v, preferred_element_type=f32)   # [H*M, D]
        ctx = ctx.astype(bf16) * hmask
        z_stack = jnp.dot(ctx, wo_ref[l], preferred_element_type=f32)  # [H*M, D]

        # sum the head row-blocks (== concat-heads @ Wo), seed with output bias
        z = z_stack[0:M, :] + bo
        for h in range(1, HEAD):
            z = z + z_stack[h * M:(h + 1) * M, :]

        # Add & LayerNorm 1  (Dropout == identity in eval)
        x = layer_norm(z + residual, g1, b1n)

        # ------------- position-wise feed-forward --------------------------------------
        residual = x
        h1 = jnp.dot(x.astype(bf16), w1_ref[l], preferred_element_type=f32) + b1_ref[l]
        h1 = jnp.maximum(h1, 0.0)
        h2 = jnp.dot(h1.astype(bf16), w2_ref[l], preferred_element_type=f32) + b2

        # Add & LayerNorm 2
        x = layer_norm(h2 + residual, g2, b2n)

    out_ref[...] = x.astype(out_ref.dtype)


def _vmem_spec():
    # whole array resident in VMEM, no grid, no pipeline buffering
    return pl.BlockSpec(memory_space=pltpu.MemorySpace.VMEM)


def encoder_stack_pallas(x2d, bias_stack, head_mask, sp):
    M, D = x2d.shape
    args = (x2d, bias_stack, head_mask,
            sp["wqkv"], sp["bqkv"], sp["wo"],
            sp["w1"], sp["b1"], sp["w2"], sp["vecs"])
    return pl.pallas_call(
        encoder_stack_kernel,
        out_shape=jax.ShapeDtypeStruct((M, D), jnp.float32),
        in_specs=[_vmem_spec() for _ in args],
        out_specs=_vmem_spec(),
    )(*args)


# ---------------- parameter construction (deterministic, synthetic) --------------------
def init_params(key):
    keys = jax.random.split(key, 4 + 6 * N_LAYERS)
    ki = iter(keys)

    def lin(k, fan_in, fan_out):
        # orientation: W is [in, out] to match the kernel's x @ W dots
        return 0.02 * jax.random.normal(k, (fan_in, fan_out), jnp.float32)

    params = {"embedding": jax.random.normal(next(ki), (VOCAB, D_MODEL), jnp.float32)}
    layers = []
    for _ in range(N_LAYERS):
        layers.append({
            "wq": lin(next(ki), D_MODEL, D_MODEL), "bq": jnp.zeros((D_MODEL,), jnp.float32),
            "wk": lin(next(ki), D_MODEL, D_MODEL), "bk": jnp.zeros((D_MODEL,), jnp.float32),
            "wv": lin(next(ki), D_MODEL, D_MODEL), "bv": jnp.zeros((D_MODEL,), jnp.float32),
            "wo": lin(next(ki), D_MODEL, D_MODEL), "bo": jnp.zeros((D_MODEL,), jnp.float32),
            "ln1_g": jnp.ones((D_MODEL,), jnp.float32),
            "ln1_b": jnp.zeros((D_MODEL,), jnp.float32),
            "w1": lin(next(ki), D_MODEL, D_FF), "b1": jnp.zeros((D_FF,), jnp.float32),
            "w2": lin(next(ki), D_FF, D_MODEL), "b2": jnp.zeros((D_MODEL,), jnp.float32),
            "ln2_g": jnp.ones((D_MODEL,), jnp.float32),
            "ln2_b": jnp.zeros((D_MODEL,), jnp.float32),
        })
    params["layers"] = layers
    return params


def prepare_layer_params(layers):
    """Pack per-layer params into a small set of stacked operands (done once).
    Matmul weights are cast to bf16 for the MXU; 1/sqrt(dk) is folded into Wq/bq."""
    bf16 = jnp.bfloat16
    scale = 1.0 / math.sqrt(DK)

    def stack(fn):
        return jnp.stack([fn(l) for l in layers])

    wqkv = stack(lambda l: jnp.concatenate(
        [l["wq"] * scale, l["wk"], l["wv"]], axis=1)).astype(bf16)            # [L, D, 3D]
    bqkv = stack(lambda l: jnp.concatenate(
        [l["bq"] * scale, l["bk"], l["bv"]], axis=0))[:, None, :]             # [L, 1, 3D]
    wo = stack(lambda l: l["wo"]).astype(bf16)                                # [L, D, D]
    w1 = stack(lambda l: l["w1"]).astype(bf16)                                # [L, D, Dff]
    b1 = stack(lambda l: l["b1"])[:, None, :]                                 # [L, 1, Dff]
    w2 = stack(lambda l: l["w2"]).astype(bf16)                                # [L, Dff, D]
    vecs = stack(lambda l: jnp.stack(
        [l["bo"], l["ln1_g"], l["ln1_b"], l["b2"], l["ln2_g"], l["ln2_b"]]))  # [L, 6, D]
    return {"wqkv": wqkv, "bqkv": bqkv, "wo": wo,
            "w1": w1, "b1": b1, "w2": w2, "vecs": vecs}


def sinusoidal_positional_encoding(max_len, d_model):
    pos = jnp.arange(max_len, dtype=jnp.float32)[:, None]            # [L, 1]
    i = jnp.arange(d_model // 2, dtype=jnp.float32)[None, :]         # [1, D/2]
    angle = pos / jnp.power(10000.0, (2.0 * i) / d_model)
    pe = jnp.zeros((max_len, d_model), jnp.float32)
    pe = pe.at[:, 0::2].set(jnp.sin(angle))
    pe = pe.at[:, 1::2].set(jnp.cos(angle))
    return pe                                                        # [max_len, d_model]


# ---------------- full encoder forward --------------------------------------------------
@jax.jit
def encoder_forward(tokens, padding_mask, embedding, stacked_params, pe_table):
    B, S = tokens.shape
    M = B * S
    # input embedding * sqrt(d_model) + positional encoding  (Dropout == identity)
    emb = embedding[tokens] * math.sqrt(D_MODEL)                     # [B, S, D]
    x = emb + pe_table[:S][None, :, :]
    x2d = x.reshape(M, D_MODEL)                                      # batch folded into M

    # additive attention bias (layer/head invariant):
    #   -1e9 for cross-batch pairs and for padded key positions, 0 otherwise
    keep = (jnp.eye(B, dtype=jnp.float32)[:, :, None]
            * padding_mask.astype(jnp.float32)[None, :, :])          # [Bq, Bk, Sk]
    keep = jnp.broadcast_to(keep[:, None, :, :], (B, S, B, S)).reshape(M, M)
    attn_bias = (1.0 - keep) * NEG                                   # [M, M]
    bias_stack = jnp.tile(attn_bias, (HEAD, 1))                      # [H*M, M]

    # head-lane mask: row block h keeps lanes h*dk:(h+1)*dk
    head_mask = jnp.repeat(
        jnp.repeat(jnp.eye(HEAD, dtype=jnp.float32), DK, axis=1),
        M, axis=0).astype(jnp.bfloat16)                              # [H*M, D]

    out2d = encoder_stack_pallas(x2d, bias_stack, head_mask, stacked_params)
    return out2d.reshape(B, S, D_MODEL)


if __name__ == "__main__":
    key = jax.random.PRNGKey(0)
    k_tok, k_par = jax.random.split(key)

    tokens = jax.random.randint(k_tok, (BATCH, SEQ), 0, VOCAB, dtype=jnp.int32)
    # 1 = real token, 0 = padding (batch 0 has two padded positions)
    padding_mask = jnp.array(
        [[1, 1, 1, 1, 1, 1, 0, 0],
         [1, 1, 1, 1, 1, 1, 1, 1]], dtype=jnp.int32)

    params = init_params(k_par)
    stacked = prepare_layer_params(params["layers"])
    pe_table = sinusoidal_positional_encoding(MAX_LEN, D_MODEL)

    out = encoder_forward(tokens, padding_mask, params["embedding"], stacked, pe_table)
    out = jax.block_until_ready(out)

    assert out.shape == (BATCH, SEQ, D_MODEL)
    assert bool(jnp.all(jnp.isfinite(out)))
    print("KERNEL_OK")
</pallas_src>

<mosaic_0001>
module attributes {stable_mosaic.version = 11 : i64} {
  func.func @encoder_stack_kernel(%arg0: memref<16x32xf32, #tpu.memory_space<vmem>>, %arg1: memref<64x16xf32, #tpu.memory_space<vmem>>, %arg2: memref<64x32xbf16, #tpu.memory_space<vmem>>, %arg3: memref<2x32x96xbf16, #tpu.memory_space<vmem>>, %arg4: memref<2x1x96xf32, #tpu.memory_space<vmem>>, %arg5: memref<2x32x32xbf16, #tpu.memory_space<vmem>>, %arg6: memref<2x32x64xbf16, #tpu.memory_space<vmem>>, %arg7: memref<2x1x64xf32, #tpu.memory_space<vmem>>, %arg8: memref<2x64x32xbf16, #tpu.memory_space<vmem>>, %arg9: memref<2x6x32xf32, #tpu.memory_space<vmem>>, %arg10: memref<16x32xf32, #tpu.memory_space<vmem>>) attributes {dimension_semantics = [], scalar_prefetch = 0 : i64, scratch_operands = 0 : i64, tpu.core_type = #tpu.core_type<tc>} {
    %c0 = arith.constant 0 : index
    %c0_0 = arith.constant 0 : index
    %0 = vector.load %arg0[%c0, %c0_0] : memref<16x32xf32, #tpu.memory_space<vmem>>, vector<16x32xf32>
    %c0_1 = arith.constant 0 : index
    %c0_2 = arith.constant 0 : index
    %1 = vector.load %arg1[%c0_1, %c0_2] : memref<64x16xf32, #tpu.memory_space<vmem>>, vector<64x16xf32>
    %c0_3 = arith.constant 0 : index
    %c0_4 = arith.constant 0 : index
    %2 = vector.load %arg2[%c0_3, %c0_4] : memref<64x32xbf16, #tpu.memory_space<vmem>>, vector<64x32xbf16>
    %c0_5 = arith.constant 0 : index
    %c0_6 = arith.constant 0 : index
    %c0_7 = arith.constant 0 : index
    %3 = vector.load %arg9[%c0_5, %c0_6, %c0_7] : memref<2x6x32xf32, #tpu.memory_space<vmem>>, vector<1x6x32xf32>
    %4 = vector.shape_cast %3 : vector<1x6x32xf32> to vector<6x32xf32>
    %5 = vector.extract_strided_slice %4 {offsets = [0, 0], sizes = [1, 32], strides = [1, 1]} : vector<6x32xf32> to vector<1x32xf32>
    %6 = vector.extract_strided_slice %4 {offsets = [1, 0], sizes = [1, 32], strides = [1, 1]} : vector<6x32xf32> to vector<1x32xf32>
    %7 = vector.extract_strided_slice %4 {offsets = [2, 0], sizes = [1, 32], strides = [1, 1]} : vector<6x32xf32> to vector<1x32xf32>
    %8 = vector.extract_strided_slice %4 {offsets = [3, 0], sizes = [1, 32], strides = [1, 1]} : vector<6x32xf32> to vector<1x32xf32>
    %9 = vector.extract_strided_slice %4 {offsets = [4, 0], sizes = [1, 32], strides = [1, 1]} : vector<6x32xf32> to vector<1x32xf32>
    %10 = vector.extract_strided_slice %4 {offsets = [5, 0], sizes = [1, 32], strides = [1, 1]} : vector<6x32xf32> to vector<1x32xf32>
    %11 = arith.truncf %0 : vector<16x32xf32> to vector<16x32xbf16>
    %c0_8 = arith.constant 0 : index
    %c0_9 = arith.constant 0 : index
    %c0_10 = arith.constant 0 : index
    %12 = vector.load %arg3[%c0_8, %c0_9, %c0_10] : memref<2x32x96xbf16, #tpu.memory_space<vmem>>, vector<1x32x96xbf16>
    %13 = vector.shape_cast %12 : vector<1x32x96xbf16> to vector<32x96xbf16>
    %cst = arith.constant dense<0.000000e+00> : vector<16x96xf32>
    %14 = tpu.matmul %11, %13, %cst {dimension_numbers = #tpu.dot_dimension_numbers<[1], [0], [0], [1], [0, 0, 1, 1], [], []>} : vector<16x32xbf16>, vector<32x96xbf16>, vector<16x96xf32> -> vector<16x96xf32>
    %c0_11 = arith.constant 0 : index
    %c0_12 = arith.constant 0 : index
    %c0_13 = arith.constant 0 : index
    %15 = vector.load %arg4[%c0_11, %c0_12, %c0_13] : memref<2x1x96xf32, #tpu.memory_space<vmem>>, vector<1x1x96xf32>
    %16 = vector.shape_cast %15 : vector<1x1x96xf32> to vector<1x96xf32>
    %17 = vector.broadcast %16 : vector<1x96xf32> to vector<16x96xf32>
    %18 = arith.addf %14, %17 : vector<16x96xf32>
    %19 = vector.extract_strided_slice %18 {offsets = [0, 0], sizes = [16, 32], strides = [1, 1]} : vector<16x96xf32> to vector<16x32xf32>
    %20 = arith.truncf %19 : vector<16x32xf32> to vector<16x32xbf16>
    %21 = vector.extract_strided_slice %18 {offsets = [0, 32], sizes = [16, 32], strides = [1, 1]} : vector<16x96xf32> to vector<16x32xf32>
    %22 = arith.truncf %21 : vector<16x32xf32> to vector<16x32xbf16>
    %23 = vector.extract_strided_slice %18 {offsets = [0, 64], sizes = [16, 32], strides = [1, 1]} : vector<16x96xf32> to vector<16x32xf32>
    %24 = arith.truncf %23 : vector<16x32xf32> to vector<16x32xbf16>
    %25 = tpu.concatenate %20, %20, %20, %20 in 0 : vector<16x32xbf16>, vector<16x32xbf16>, vector<16x32xbf16>, vector<16x32xbf16> -> vector<64x32xbf16>
    %26 = arith.mulf %25, %2 : vector<64x32xbf16>
    %cst_14 = arith.constant dense<0.000000e+00> : vector<64x16xf32>
    %27 = tpu.matmul %26, %22, %cst_14 {dimension_numbers = #tpu.dot_dimension_numbers<[1], [1], [0], [0], [0, 0, 1, 0], [], []>} : vector<64x32xbf16>, vector<16x32xbf16>, vector<64x16xf32> -> vector<64x16xf32>
    %28 = arith.addf %27, %1 : vector<64x16xf32>
    %cst_15 = arith.constant dense<0xFF800000> : vector<64xf32>
    %29 = vector.multi_reduction <maximumf>, %28, %cst_15 [1] : vector<64x16xf32> to vector<64xf32>
    %30 = vector.shape_cast %29 : vector<64xf32> to vector<64x1xf32>
    %31 = vector.broadcast %30 : vector<64x1xf32> to vector<64x16xf32>
    %32 = arith.subf %28, %31 : vector<64x16xf32>
    %33 = math.exp %32 : vector<64x16xf32>
    %cst_16 = arith.constant dense<0.000000e+00> : vector<64xf32>
    %34 = vector.multi_reduction <add>, %33, %cst_16 [1] : vector<64x16xf32> to vector<64xf32>
    %35 = vector.shape_cast %34 : vector<64xf32> to vector<64x1xf32>
    %36 = tpu.reciprocal %35 {approx = true} : vector<64x1xf32> -> vector<64x1xf32>
    %37 = vector.broadcast %36 : vector<64x1xf32> to vector<64x16xf32>
    %38 = arith.mulf %33, %37 : vector<64x16xf32>
    %39 = arith.truncf %38 : vector<64x16xf32> to vector<64x16xbf16>
    %cst_17 = arith.constant dense<0.000000e+00> : vector<64x32xf32>
    %40 = tpu.matmul %39, %24, %cst_17 {dimension_numbers = #tpu.dot_dimension_numbers<[1], [0], [0], [1], [0, 0, 1, 1], [], []>} : vector<64x16xbf16>, vector<16x32xbf16>, vector<64x32xf32> -> vector<64x32xf32>
    %41 = arith.truncf %40 : vector<64x32xf32> to vector<64x32xbf16>
    %42 = arith.mulf %41, %2 : vector<64x32xbf16>
    %c0_18 = arith.constant 0 : index
    %c0_19 = arith.constant 0 : index
    %c0_20 = arith.constant 0 : index
    %43 = vector.load %arg5[%c0_18, %c0_19, %c0_20] : memref<2x32x32xbf16, #tpu.memory_space<vmem>>, vector<1x32x32xbf16>
    %44 = vector.shape_cast %43 : vector<1x32x32xbf16> to vector<32x32xbf16>
    %cst_21 = arith.constant dense<0.000000e+00> : vector<64x32xf32>
    %45 = tpu.matmul %42, %44, %cst_21 {dimension_numbers = #tpu.dot_dimension_numbers<[1], [0], [0], [1], [0, 0, 1, 1], [], []>} : vector<64x32xbf16>, vector<32x32xbf16>, vector<64x32xf32> -> vector<64x32xf32>
    %46 = vector.extract_strided_slice %45 {offsets = [0, 0], sizes = [16, 32], strides = [1, 1]} : vector<64x32xf32> to vector<16x32xf32>
    %47 = vector.broadcast %5 : vector<1x32xf32> to vector<16x32xf32>
    %48 = arith.addf %46, %47 : vector<16x32xf32>
    %49 = vector.extract_strided_slice %45 {offsets = [16, 0], sizes = [16, 32], strides = [1, 1]} : vector<64x32xf32> to vector<16x32xf32>
    %50 = arith.addf %48, %49 : vector<16x32xf32>
    %51 = vector.extract_strided_slice %45 {offsets = [32, 0], sizes = [16, 32], strides = [1, 1]} : vector<64x32xf32> to vector<16x32xf32>
    %52 = arith.addf %50, %51 : vector<16x32xf32>
    %53 = vector.extract_strided_slice %45 {offsets = [48, 0], sizes = [16, 32], strides = [1, 1]} : vector<64x32xf32> to vector<16x32xf32>
    %54 = arith.addf %52, %53 : vector<16x32xf32>
    %55 = arith.addf %54, %0 : vector<16x32xf32>
    %cst_22 = arith.constant dense<0.000000e+00> : vector<16xf32>
    %56 = vector.multi_reduction <add>, %55, %cst_22 [1] : vector<16x32xf32> to vector<16xf32>
    %57 = vector.shape_cast %56 : vector<16xf32> to vector<16x1xf32>
    %cst_23 = arith.constant 3.200000e+01 : f32
    %58 = vector.broadcast %cst_23 : f32 to vector<16x1xf32>
    %59 = arith.divf %57, %58 : vector<16x1xf32>
    %60 = vector.broadcast %59 : vector<16x1xf32> to vector<16x32xf32>
    %61 = arith.subf %55, %60 : vector<16x32xf32>
    %62 = arith.mulf %61, %61 : vector<16x32xf32>
    %cst_24 = arith.constant dense<0.000000e+00> : vector<16xf32>
    %63 = vector.multi_reduction <add>, %62, %cst_24 [1] : vector<16x32xf32> to vector<16xf32>
    %64 = vector.shape_cast %63 : vector<16xf32> to vector<16x1xf32>
    %cst_25 = arith.constant 3.200000e+01 : f32
    %65 = vector.broadcast %cst_25 : f32 to vector<16x1xf32>
    %66 = arith.divf %64, %65 : vector<16x1xf32>
    %67 = vector.broadcast %59 : vector<16x1xf32> to vector<16x32xf32>
    %68 = arith.subf %55, %67 : vector<16x32xf32>
    %cst_26 = arith.constant 9.99999974E-6 : f32
    %69 = vector.broadcast %cst_26 : f32 to vector<16x1xf32>
    %70 = arith.addf %66, %69 : vector<16x1xf32>
    %71 = math.rsqrt %70 : vector<16x1xf32>
    %72 = vector.broadcast %71 : vector<16x1xf32> to vector<16x32xf32>
    %73 = arith.mulf %68, %72 : vector<16x32xf32>
    %74 = vector.broadcast %6 : vector<1x32xf32> to vector<16x32xf32>
    %75 = arith.mulf %73, %74 : vector<16x32xf32>
    %76 = vector.broadcast %7 : vector<1x32xf32> to vector<16x32xf32>
    %77 = arith.addf %75, %76 : vector<16x32xf32>
    %78 = arith.truncf %77 : vector<16x32xf32> to vector<16x32xbf16>
    %c0_27 = arith.constant 0 : index
    %c0_28 = arith.constant 0 : index
    %c0_29 = arith.constant 0 : index
    %79 = vector.load %arg6[%c0_27, %c0_28, %c0_29] : memref<2x32x64xbf16, #tpu.memory_space<vmem>>, vector<1x32x64xbf16>
    %80 = vector.shape_cast %79 : vector<1x32x64xbf16> to vector<32x64xbf16>
    %cst_30 = arith.constant dense<0.000000e+00> : vector<16x64xf32>
    %81 = tpu.matmul %78, %80, %cst_30 {dimension_numbers = #tpu.dot_dimension_numbers<[1], [0], [0], [1], [0, 0, 1, 1], [], []>} : vector<16x32xbf16>, vector<32x64xbf16>, vector<16x64xf32> -> vector<16x64xf32>
    %c0_31 = arith.constant 0 : index
    %c0_32 = arith.constant 0 : index
    %c0_33 = arith.constant 0 : index
    %82 = vector.load %arg7[%c0_31, %c0_32, %c0_33] : memref<2x1x64xf32, #tpu.memory_space<vmem>>, vector<1x1x64xf32>
    %83 = vector.shape_cast %82 : vector<1x1x64xf32> to vector<1x64xf32>
    %84 = vector.broadcast %83 : vector<1x64xf32> to vector<16x64xf32>
    %85 = arith.addf %81, %84 : vector<16x64xf32>
    %cst_34 = arith.constant 0.000000e+00 : f32
    %86 = vector.broadcast %cst_34 : f32 to vector<16x64xf32>
    %87 = arith.maximumf %85, %86 : vector<16x64xf32>
    %88 = arith.truncf %87 : vector<16x64xf32> to vector<16x64xbf16>
    %c0_35 = arith.constant 0 : index
    %c0_36 = arith.constant 0 : index
    %c0_37 = arith.constant 0 : index
    %89 = vector.load %arg8[%c0_35, %c0_36, %c0_37] : memref<2x64x32xbf16, #tpu.memory_space<vmem>>, vector<1x64x32xbf16>
    %90 = vector.shape_cast %89 : vector<1x64x32xbf16> to vector<64x32xbf16>
    %cst_38 = arith.constant dense<0.000000e+00> : vector<16x32xf32>
    %91 = tpu.matmul %88, %90, %cst_38 {dimension_numbers = #tpu.dot_dimension_numbers<[1], [0], [0], [1], [0, 0, 1, 1], [], []>} : vector<16x64xbf16>, vector<64x32xbf16>, vector<16x32xf32> -> vector<16x32xf32>
    %92 = vector.broadcast %8 : vector<1x32xf32> to vector<16x32xf32>
    %93 = arith.addf %91, %92 : vector<16x32xf32>
    %94 = arith.addf %93, %77 : vector<16x32xf32>
    %cst_39 = arith.constant dense<0.000000e+00> : vector<16xf32>
    %95 = vector.multi_reduction <add>, %94, %cst_39 [1] : vector<16x32xf32> to vector<16xf32>
    %96 = vector.shape_cast %95 : vector<16xf32> to vector<16x1xf32>
    %cst_40 = arith.constant 3.200000e+01 : f32
    %97 = vector.broadcast %cst_40 : f32 to vector<16x1xf32>
    %98 = arith.divf %96, %97 : vector<16x1xf32>
    %99 = vector.broadcast %98 : vector<16x1xf32> to vector<16x32xf32>
    %100 = arith.subf %94, %99 : vector<16x32xf32>
    %101 = arith.mulf %100, %100 : vector<16x32xf32>
    %cst_41 = arith.constant dense<0.000000e+00> : vector<16xf32>
    %102 = vector.multi_reduction <add>, %101, %cst_41 [1] : vector<16x32xf32> to vector<16xf32>
    %103 = vector.shape_cast %102 : vector<16xf32> to vector<16x1xf32>
    %cst_42 = arith.constant 3.200000e+01 : f32
    %104 = vector.broadcast %cst_42 : f32 to vector<16x1xf32>
    %105 = arith.divf %103, %104 : vector<16x1xf32>
    %106 = vector.broadcast %98 : vector<16x1xf32> to vector<16x32xf32>
    %107 = arith.subf %94, %106 : vector<16x32xf32>
    %cst_43 = arith.constant 9.99999974E-6 : f32
    %108 = vector.broadcast %cst_43 : f32 to vector<16x1xf32>
    %109 = arith.addf %105, %108 : vector<16x1xf32>
    %110 = math.rsqrt %109 : vector<16x1xf32>
    %111 = vector.broadcast %110 : vector<16x1xf32> to vector<16x32xf32>
    %112 = arith.mulf %107, %111 : vector<16x32xf32>
    %113 = vector.broadcast %9 : vector<1x32xf32> to vector<16x32xf32>
    %114 = arith.mulf %112, %113 : vector<16x32xf32>
    %115 = vector.broadcast %10 : vector<1x32xf32> to vector<16x32xf32>
    %116 = arith.addf %114, %115 : vector<16x32xf32>
    %c1 = arith.constant 1 : index
    %c0_44 = arith.constant 0 : index
    %c0_45 = arith.constant 0 : index
    %117 = vector.load %arg9[%c1, %c0_44, %c0_45] : memref<2x6x32xf32, #tpu.memory_space<vmem>>, vector<1x6x32xf32>
    %118 = vector.shape_cast %117 : vector<1x6x32xf32> to vector<6x32xf32>
    %119 = vector.extract_strided_slice %118 {offsets = [0, 0], sizes = [1, 32], strides = [1, 1]} : vector<6x32xf32> to vector<1x32xf32>
    %120 = vector.extract_strided_slice %118 {offsets = [1, 0], sizes = [1, 32], strides = [1, 1]} : vector<6x32xf32> to vector<1x32xf32>
    %121 = vector.extract_strided_slice %118 {offsets = [2, 0], sizes = [1, 32], strides = [1, 1]} : vector<6x32xf32> to vector<1x32xf32>
    %122 = vector.extract_strided_slice %118 {offsets = [3, 0], sizes = [1, 32], strides = [1, 1]} : vector<6x32xf32> to vector<1x32xf32>
    %123 = vector.extract_strided_slice %118 {offsets = [4, 0], sizes = [1, 32], strides = [1, 1]} : vector<6x32xf32> to vector<1x32xf32>
    %124 = vector.extract_strided_slice %118 {offsets = [5, 0], sizes = [1, 32], strides = [1, 1]} : vector<6x32xf32> to vector<1x32xf32>
    %125 = arith.truncf %116 : vector<16x32xf32> to vector<16x32xbf16>
    %c1_46 = arith.constant 1 : index
    %c0_47 = arith.constant 0 : index
    %c0_48 = arith.constant 0 : index
    %126 = vector.load %arg3[%c1_46, %c0_47, %c0_48] : memref<2x32x96xbf16, #tpu.memory_space<vmem>>, vector<1x32x96xbf16>
    %127 = vector.shape_cast %126 : vector<1x32x96xbf16> to vector<32x96xbf16>
    %cst_49 = arith.constant dense<0.000000e+00> : vector<16x96xf32>
    %128 = tpu.matmul %125, %127, %cst_49 {dimension_numbers = #tpu.dot_dimension_numbers<[1], [0], [0], [1], [0, 0, 1, 1], [], []>} : vector<16x32xbf16>, vector<32x96xbf16>, vector<16x96xf32> -> vector<16x96xf32>
    %c1_50 = arith.constant 1 : index
    %c0_51 = arith.constant 0 : index
    %c0_52 = arith.constant 0 : index
    %129 = vector.load %arg4[%c1_50, %c0_51, %c0_52] : memref<2x1x96xf32, #tpu.memory_space<vmem>>, vector<1x1x96xf32>
    %130 = vector.shape_cast %129 : vector<1x1x96xf32> to vector<1x96xf32>
    %131 = vector.broadcast %130 : vector<1x96xf32> to vector<16x96xf32>
    %132 = arith.addf %128, %131 : vector<16x96xf32>
    %133 = vector.extract_strided_slice %132 {offsets = [0, 0], sizes = [16, 32], strides = [1, 1]} : vector<16x96xf32> to vector<16x32xf32>
    %134 = arith.truncf %133 : vector<16x32xf32> to vector<16x32xbf16>
    %135 = vector.extract_strided_slice %132 {offsets = [0, 32], sizes = [16, 32], strides = [1, 1]} : vector<16x96xf32> to vector<16x32xf32>
    %136 = arith.truncf %135 : vector<16x32xf32> to vector<16x32xbf16>
    %137 = vector.extract_strided_slice %132 {offsets = [0, 64], sizes = [16, 32], strides = [1, 1]} : vector<16x96xf32> to vector<16x32xf32>
    %138 = arith.truncf %137 : vector<16x32xf32> to vector<16x32xbf16>
    %139 = tpu.concatenate %134, %134, %134, %134 in 0 : vector<16x32xbf16>, vector<16x32xbf16>, vector<16x32xbf16>, vector<16x32xbf16> -> vector<64x32xbf16>
    %140 = arith.mulf %139, %2 : vector<64x32xbf16>
    %cst_53 = arith.constant dense<0.000000e+00> : vector<64x16xf32>
    %141 = tpu.matmul %140, %136, %cst_53 {dimension_numbers = #tpu.dot_dimension_numbers<[1], [1], [0], [0], [0, 0, 1, 0], [], []>} : vector<64x32xbf16>, vector<16x32xbf16>, vector<64x16xf32> -> vector<64x16xf32>
    %142 = arith.addf %141, %1 : vector<64x16xf32>
    %cst_54 = arith.constant dense<0xFF800000> : vector<64xf32>
    %143 = vector.multi_reduction <maximumf>, %142, %cst_54 [1] : vector<64x16xf32> to vector<64xf32>
    %144 = vector.shape_cast %143 : vector<64xf32> to vector<64x1xf32>
    %145 = vector.broadcast %144 : vector<64x1xf32> to vector<64x16xf32>
    %146 = arith.subf %142, %145 : vector<64x16xf32>
    %147 = math.exp %146 : vector<64x16xf32>
    %cst_55 = arith.constant dense<0.000000e+00> : vector<64xf32>
    %148 = vector.multi_reduction <add>, %147, %cst_55 [1] : vector<64x16xf32> to vector<64xf32>
    %149 = vector.shape_cast %148 : vector<64xf32> to vector<64x1xf32>
    %150 = tpu.reciprocal %149 {approx = true} : vector<64x1xf32> -> vector<64x1xf32>
    %151 = vector.broadcast %150 : vector<64x1xf32> to vector<64x16xf32>
    %152 = arith.mulf %147, %151 : vector<64x16xf32>
    %153 = arith.truncf %152 : vector<64x16xf32> to vector<64x16xbf16>
    %cst_56 = arith.constant dense<0.000000e+00> : vector<64x32xf32>
    %154 = tpu.matmul %153, %138, %cst_56 {dimension_numbers = #tpu.dot_dimension_numbers<[1], [0], [0], [1], [0, 0, 1, 1], [], []>} : vector<64x16xbf16>, vector<16x32xbf16>, vector<64x32xf32> -> vector<64x32xf32>
    %155 = arith.truncf %154 : vector<64x32xf32> to vector<64x32xbf16>
    %156 = arith.mulf %155, %2 : vector<64x32xbf16>
    %c1_57 = arith.constant 1 : index
    %c0_58 = arith.constant 0 : index
    %c0_59 = arith.constant 0 : index
    %157 = vector.load %arg5[%c1_57, %c0_58, %c0_59] : memref<2x32x32xbf16, #tpu.memory_space<vmem>>, vector<1x32x32xbf16>
    %158 = vector.shape_cast %157 : vector<1x32x32xbf16> to vector<32x32xbf16>
    %cst_60 = arith.constant dense<0.000000e+00> : vector<64x32xf32>
    %159 = tpu.matmul %156, %158, %cst_60 {dimension_numbers = #tpu.dot_dimension_numbers<[1], [0], [0], [1], [0, 0, 1, 1], [], []>} : vector<64x32xbf16>, vector<32x32xbf16>, vector<64x32xf32> -> vector<64x32xf32>
    %160 = vector.extract_strided_slice %159 {offsets = [0, 0], sizes = [16, 32], strides = [1, 1]} : vector<64x32xf32> to vector<16x32xf32>
    %161 = vector.broadcast %119 : vector<1x32xf32> to vector<16x32xf32>
    %162 = arith.addf %160, %161 : vector<16x32xf32>
    %163 = vector.extract_strided_slice %159 {offsets = [16, 0], sizes = [16, 32], strides = [1, 1]} : vector<64x32xf32> to vector<16x32xf32>
    %164 = arith.addf %162, %163 : vector<16x32xf32>
    %165 = vector.extract_strided_slice %159 {offsets = [32, 0], sizes = [16, 32], strides = [1, 1]} : vector<64x32xf32> to vector<16x32xf32>
    %166 = arith.addf %164, %165 : vector<16x32xf32>
    %167 = vector.extract_strided_slice %159 {offsets = [48, 0], sizes = [16, 32], strides = [1, 1]} : vector<64x32xf32> to vector<16x32xf32>
    %168 = arith.addf %166, %167 : vector<16x32xf32>
    %169 = arith.addf %168, %116 : vector<16x32xf32>
    %cst_61 = arith.constant dense<0.000000e+00> : vector<16xf32>
    %170 = vector.multi_reduction <add>, %169, %cst_61 [1] : vector<16x32xf32> to vector<16xf32>
    %171 = vector.shape_cast %170 : vector<16xf32> to vector<16x1xf32>
    %cst_62 = arith.constant 3.200000e+01 : f32
    %172 = vector.broadcast %cst_62 : f32 to vector<16x1xf32>
    %173 = arith.divf %171, %172 : vector<16x1xf32>
    %174 = vector.broadcast %173 : vector<16x1xf32> to vector<16x32xf32>
    %175 = arith.subf %169, %174 : vector<16x32xf32>
    %176 = arith.mulf %175, %175 : vector<16x32xf32>
    %cst_63 = arith.constant dense<0.000000e+00> : vector<16xf32>
    %177 = vector.multi_reduction <add>, %176, %cst_63 [1] : vector<16x32xf32> to vector<16xf32>
    %178 = vector.shape_cast %177 : vector<16xf32> to vector<16x1xf32>
    %cst_64 = arith.constant 3.200000e+01 : f32
    %179 = vector.broadcast %cst_64 : f32 to vector<16x1xf32>
    %180 = arith.divf %178, %179 : vector<16x1xf32>
    %181 = vector.broadcast %173 : vector<16x1xf32> to vector<16x32xf32>
    %182 = arith.subf %169, %181 : vector<16x32xf32>
    %cst_65 = arith.constant 9.99999974E-6 : f32
    %183 = vector.broadcast %cst_65 : f32 to vector<16x1xf32>
    %184 = arith.addf %180, %183 : vector<16x1xf32>
    %185 = math.rsqrt %184 : vector<16x1xf32>
    %186 = vector.broadcast %185 : vector<16x1xf32> to vector<16x32xf32>
    %187 = arith.mulf %182, %186 : vector<16x32xf32>
    %188 = vector.broadcast %120 : vector<1x32xf32> to vector<16x32xf32>
    %189 = arith.mulf %187, %188 : vector<16x32xf32>
    %190 = vector.broadcast %121 : vector<1x32xf32> to vector<16x32xf32>
    %191 = arith.addf %189, %190 : vector<16x32xf32>
    %192 = arith.truncf %191 : vector<16x32xf32> to vector<16x32xbf16>
    %c1_66 = arith.constant 1 : index
    %c0_67 = arith.constant 0 : index
    %c0_68 = arith.constant 0 : index
    %193 = vector.load %arg6[%c1_66, %c0_67, %c0_68] : memref<2x32x64xbf16, #tpu.memory_space<vmem>>, vector<1x32x64xbf16>
    %194 = vector.shape_cast %193 : vector<1x32x64xbf16> to vector<32x64xbf16>
    %cst_69 = arith.constant dense<0.000000e+00> : vector<16x64xf32>
    %195 = tpu.matmul %192, %194, %cst_69 {dimension_numbers = #tpu.dot_dimension_numbers<[1], [0], [0], [1], [0, 0, 1, 1], [], []>} : vector<16x32xbf16>, vector<32x64xbf16>, vector<16x64xf32> -> vector<16x64xf32>
    %c1_70 = arith.constant 1 : index
    %c0_71 = arith.constant 0 : index
    %c0_72 = arith.constant 0 : index
    %196 = vector.load %arg7[%c1_70, %c0_71, %c0_72] : memref<2x1x64xf32, #tpu.memory_space<vmem>>, vector<1x1x64xf32>
    %197 = vector.shape_cast %196 : vector<1x1x64xf32> to vector<1x64xf32>
    %198 = vector.broadcast %197 : vector<1x64xf32> to vector<16x64xf32>
    %199 = arith.addf %195, %198 : vector<16x64xf32>
    %cst_73 = arith.constant 0.000000e+00 : f32
    %200 = vector.broadcast %cst_73 : f32 to vector<16x64xf32>
    %201 = arith.maximumf %199, %200 : vector<16x64xf32>
    %202 = arith.truncf %201 : vector<16x64xf32> to vector<16x64xbf16>
    %c1_74 = arith.constant 1 : index
    %c0_75 = arith.constant 0 : index
    %c0_76 = arith.constant 0 : index
    %203 = vector.load %arg8[%c1_74, %c0_75, %c0_76] : memref<2x64x32xbf16, #tpu.memory_space<vmem>>, vector<1x64x32xbf16>
    %204 = vector.shape_cast %203 : vector<1x64x32xbf16> to vector<64x32xbf16>
    %cst_77 = arith.constant dense<0.000000e+00> : vector<16x32xf32>
    %205 = tpu.matmul %202, %204, %cst_77 {dimension_numbers = #tpu.dot_dimension_numbers<[1], [0], [0], [1], [0, 0, 1, 1], [], []>} : vector<16x64xbf16>, vector<64x32xbf16>, vector<16x32xf32> -> vector<16x32xf32>
    %206 = vector.broadcast %122 : vector<1x32xf32> to vector<16x32xf32>
    %207 = arith.addf %205, %206 : vector<16x32xf32>
    %208 = arith.addf %207, %191 : vector<16x32xf32>
    %cst_78 = arith.constant dense<0.000000e+00> : vector<16xf32>
    %209 = vector.multi_reduction <add>, %208, %cst_78 [1] : vector<16x32xf32> to vector<16xf32>
    %210 = vector.shape_cast %209 : vector<16xf32> to vector<16x1xf32>
    %cst_79 = arith.constant 3.200000e+01 : f32
    %211 = vector.broadcast %cst_79 : f32 to vector<16x1xf32>
    %212 = arith.divf %210, %211 : vector<16x1xf32>
    %213 = vector.broadcast %212 : vector<16x1xf32> to vector<16x32xf32>
    %214 = arith.subf %208, %213 : vector<16x32xf32>
    %215 = arith.mulf %214, %214 : vector<16x32xf32>
    %cst_80 = arith.constant dense<0.000000e+00> : vector<16xf32>
    %216 = vector.multi_reduction <add>, %215, %cst_80 [1] : vector<16x32xf32> to vector<16xf32>
    %217 = vector.shape_cast %216 : vector<16xf32> to vector<16x1xf32>
    %cst_81 = arith.constant 3.200000e+01 : f32
    %218 = vector.broadcast %cst_81 : f32 to vector<16x1xf32>
    %219 = arith.divf %217, %218 : vector<16x1xf32>
    %220 = vector.broadcast %212 : vector<16x1xf32> to vector<16x32xf32>
    %221 = arith.subf %208, %220 : vector<16x32xf32>
    %cst_82 = arith.constant 9.99999974E-6 : f32
    %222 = vector.broadcast %cst_82 : f32 to vector<16x1xf32>
    %223 = arith.addf %219, %222 : vector<16x1xf32>
    %224 = math.rsqrt %223 : vector<16x1xf32>
    %225 = vector.broadcast %224 : vector<16x1xf32> to vector<16x32xf32>
    %226 = arith.mulf %221, %225 : vector<16x32xf32>
    %227 = vector.broadcast %123 : vector<1x32xf32> to vector<16x32xf32>
    %228 = arith.mulf %226, %227 : vector<16x32xf32>
    %229 = vector.broadcast %124 : vector<1x32xf32> to vector<16x32xf32>
    %230 = arith.addf %228, %229 : vector<16x32xf32>
    %c0_83 = arith.constant 0 : index
    %c0_84 = arith.constant 0 : index
    %231 = vector.load %arg10[%c0_83, %c0_84] : memref<16x32xf32, #tpu.memory_space<vmem>>, vector<16x32xf32>
    tpu.vector_store %arg10[%c0_83, %c0_84], %230 {strides = array<i32>} : memref<16x32xf32, #tpu.memory_space<vmem>>, vector<16x32xf32>,
    return
  }
}

</mosaic_0001>

<bundles_post_ra>
// kernel: encoder_forward.1
= control target key start
LH: loop header
LB: loop body
LE: loop exit
PB: predicated region body
PF: predicated region fallthrough
CT: control target
= control target key end

     0   :  { %v1846_v1 = vmov 0.0   ;;  %vm1847_vm0 = vmmov 0   ;;  %vm80_vm1 = vcmask 261120   ;;  %s2300_s0 = inlined_call_operand.vmem [shape: f32[16,32], index: 0, kind: input, shape index: {}]   ;;  %s2301_s1 = inlined_call_operand.vmem [shape: f32[64,16], index: 1, kind: input, shape index: {}]   ;;  %s2302_s2 = inlined_call_operand.vmem [shape: bf16[64,32], index: 2, kind: input, shape index: {}]   ;;  %s2303_s3 = inlined_call_operand.vmem [shape: bf16[2,32,96], index: 3, kind: input, shape index: {}]   ;;  %s2304_s4 = inlined_call_operand.vmem [shape: f32[2,1,96], index: 4, kind: input, shape index: {}]   ;;  %s2305_s5 = inlined_call_operand.vmem [shape: bf16[2,32,32], index: 5, kind: input, shape index: {}]   ;;  %s2306_s6 = inlined_call_operand.vmem [shape: bf16[2,32,64], index: 6, kind: input, shape index: {}]   ;;  %s2307_s7 = inlined_call_operand.vmem [shape: f32[2,1,64], index: 7, kind: input, shape index: {}]   ;;  %s2308_s8 = inlined_call_operand.vmem [shape: bf16[2,64,32], index: 8, kind: input, shape index: {}]   ;;  %s2309_s9 = inlined_call_operand.vmem [shape: f32[2,6,32], index: 9, kind: input, shape index: {}]   ;;  %s2310_s10 = inlined_call_operand.hbm [shape: f32[16,32], index: 10, kind: output, shape index: {}]  }
   0x1   :  { %v1718_v0 = vld [vmem:[%s2303_s3] sm:$0xff]   ;;  %1589 = vmatprep.subr.bf16.mxu1 %v1846_v1  ;;  %v1719_v2 = vld [vmem:[%s2303_s3 + $0x8] sm:$0xff]   ;;  %1593 = vmatprep.mubr.msk.bf16.mxu1 %vm1847_vm0, %v1846_v1 }
   0x2   :  { %1590 = vmatpush3.bf16.msra.mxu1 %v1718_v0  ;;  %v1920_v3 = vld [vmem:[%s2300_s0] sm:$0xff]  ;;  %v1925_v4 = vld [vmem:[%s2300_s0 + $0x8] sm:$0xff] }
   0x3   :  { %1591 = vmatprep.subr.bf16.mxu1 %v1846_v1  ;;  %v56_v5 = vpack.c.bf16 %v1925_v4, %v1920_v3 }
   0x6   :  { %1592 = vmatpush3.bf16.msra.mxu1 %v1719_v2 }
   0x9   :  { %1594 = vmatmul.mubr.msk.bf16.vlgmr.msra.gmra.mrb[0].mxu1 %vm80_vm1, %v56_v5 }
   0xa   :  { %15 = vsyncpa [#allocation3], 0  ;;  %v1454_v6 = vld [vmem:[%s2304_s4] ss:$0 sm:$0xff]  ;;  %s1848_s24 = smov 96   ;;  %v1951_v18 = vld [vmem:[%s2302_s2 + $0x8] sm:$0xff]  }
   0xb   :  { %v1937_v13 = vld [vmem:[%s2302_s2] sm:$0xff]   ;;  %v1956_v19 = vld [vmem:[%s2302_s2 + $0x10] sm:$0xff]   ;;  %v1967_v22 = vld [vmem:[%s2302_s2 + $0x18] sm:$0xff]   ;;  %vm237_vm2 = vcmask 130048   ;;  %vm671_vm3 = vcmask 523264  }
   0xc   :  { %v1975_v24 = vld [vmem:[%s2301_s1 + $0x10] sm:$0xff]  ;;  %v1980_v25 = vld [vmem:[%s2301_s1] sm:$0xff]  ;;  %v1985_v27 = vld [vmem:[%s2301_s1 + $0x18] sm:$0xff] }
   0xd   :  { %v1994_v35 = vld [vmem:[%s2301_s1 + $0x8] sm:$0xff]  ;;  %v2002_v39 = vld [vmem:[%s2301_s1 + $0x30] sm:$0xff]  ;;  %v2009_v46 = vld [vmem:[%s2301_s1 + $0x20] sm:$0xff] }
   0xe   :  { %v2016_v49 = vld [vmem:[%s2301_s1 + $0x28] sm:$0xff]  ;;  %v2023_v52 = vld [vmem:[%s2301_s1 + $0x38] sm:$0xff]  ;;  %s1849_s1 = smov 64  }
  0xdc   :  { %v118_v7 = vpop.f32.mrb[0].mxu1 }
  0xdd   :  { %v1595_v8 = vpop.f32.mrb[1].mxu1  ;;  %v119_v10 = vadd.f32 %v1454_v6, %v118_v7 }
  0xde   :  { %v121_v9 = vpop.f32.mrb[2].mxu1 }
  0xdf   :  { %v122_v11 = vadd.f32 %v1454_v6, %v121_v9  ;;  %v1596_v12 = vpop.f32.mrb[3].mxu1 }
  0xe1   :  { %v1939_v14 = vpack.c.bf16 %v122_v11, %v119_v10 }
  0xe3   :  { %155 = vrot.lane.b32.xlu0 %v1939_v14, %s1848_s24  ;;  %v150_v15 = vmul.bf16 %v1937_v13, %v1939_v14  ;;  %v151_v20 = vmul.bf16 %v1951_v18, %v1939_v14  ;;  %v152_v21 = vmul.bf16 %v1956_v19, %v1939_v14  ;;  %v153_v23 = vmul.bf16 %v1967_v22, %v1939_v14 }
  0xe5   :  { %1599 = vmatprep.mubr.msk.bf16.mxu1 %vm80_vm1, %v150_v15 }
 0x155   :  { %v156_v16 = vpop.permute.xlu0 %155 }
 0x156   :  { %v170_v17 = vsel %vm80_vm1, %v156_v16, 0  ;;  %1709 = vmatprep.subr.msk.bf16.mxu1 %vm80_vm1, %v156_v16 }
 0x157   :  { %1598 = vmatpush3.bf16.xpose.msra.mxu1 %v170_v17 }
 0x15e   :  { %1600 = vmatmul.mubr.msk.bf16.vlgmr.msra.gmra.mrb[4].mxu1 %vm80_vm1, %v151_v20 }
 0x15f   :  { %1603 = vmatprep.mubr.msk.bf16.mxu1 %vm80_vm1, %v152_v21 }
 0x166   :  { %1604 = vmatmul.mubr.msk.bf16.gmra.mrb[8].mxu1 %vm80_vm1, %v153_v23 }
 0x231   :  { %v1601_v26 = vpop.f32.mrb[4].mxu1 }
 0x232   :  { %v215_v28 = vadd.f32 %v1601_v26, %v1975_v24  ;;  %v206_v29 = vpop.f32.mrb[5].mxu1 }
 0x233   :  { %v207_v30 = vadd.f32 %v206_v29, %v1980_v25  ;;  %v1602_v31 = vpop.f32.mrb[6].mxu1 }
 0x234   :  { %v218_v32 = vadd.f32 %v1602_v31, %v1985_v27  ;;  %v209_v33 = vpop.f32.mrb[7].mxu1  ;;  %v244_v34 = vsel %vm237_vm2, %v215_v28, -inf }
 0x235   :  { %245 = vmax.xlane.f32.xlu1 %v244_v34  ;;  %v238_v36 = vsel %vm237_vm2, %v207_v30, -inf  ;;  %v210_v37 = vadd.f32 %v209_v33, %v1994_v35 }
 0x236   :  { %239 = vmax.xlane.f32.xlu0 %v238_v36  ;;  %v247_v38 = vsel %vm237_vm2, %v218_v32, -inf }
 0x237   :  { %v241_v45 = vsel %vm237_vm2, %v210_v37, -inf }
 0x239   :  { %248 = vmax.xlane.f32.xlu1 %v247_v38  ;;  %v1605_v40 = vpop.f32.mrb[8].mxu1 }
 0x23a   :  { %v222_v41 = vpop.f32.mrb[9].mxu1  ;;  %v231_v43 = vadd.f32 %v1605_v40, %v2002_v39 }
 0x23b   :  { %v1606_v42 = vpop.f32.mrb[10].mxu1  ;;  %v223_v47 = vadd.f32 %v222_v41, %v2009_v46 }
 0x23c   :  { %v225_v44 = vpop.f32.mrb[11].mxu1  ;;  %v256_v48 = vsel %vm237_vm2, %v231_v43, -inf  ;;  %v234_v53 = vadd.f32 %v1606_v42, %v2023_v52 }
 0x23d   :  { %242 = vmax.xlane.f32.xlu1 %v241_v45  ;;  %v226_v50 = vadd.f32 %v225_v44, %v2016_v49  ;;  %v250_v51 = vsel %vm237_vm2, %v223_v47, -inf  ;;  %v1724_v45 = vld [vmem:[%s2305_s5] sm:$0xff]  }
 0x23e   :  { %v259_v55 = vsel %vm237_vm2, %v234_v53, -inf  ;;  %1617 = vmatprep.subr.bf16.mxu1 %v1724_v45 }
 0x23f   :  { %v253_v54 = vsel %vm237_vm2, %v226_v50, -inf  ;;  %1618 = vmatpush3.bf16.msra.mxu1 %v1724_v45 }
 0x241   :  { %257 = vmax.xlane.f32.xlu1 %v256_v48 }
 0x245   :  { %251 = vmax.xlane.f32.xlu1 %v250_v51 }
 0x249   :  { %254 = vmax.xlane.f32.xlu1 %v253_v54 }
 0x24d   :  { %260 = vmax.xlane.f32.xlu1 %v259_v55 }
 0x2c2   :  { %v246_v56 = vpop.xlane.xlu1 %245 }
 0x2c3   :  { %v264_v57 = vsub.f32 %v215_v28, %v246_v56  ;;  %v240_v58 = vpop.xlane.xlu0 %239 }
 0x2c4   :  { %v262_v59 = vsub.f32 %v207_v30, %v240_v58 }
 0x2c5   :  { %v274_v60 = vmul.f32 1.442695, %v264_v57 }
 0x2c6   :  { %v270_v61 = vmul.f32 1.442695, %v262_v59  ;;  %v249_v62 = vpop.xlane.xlu1 %248 }
 0x2c7   :  { %1742 = vpow2.f32 %v274_v60  ;;  %v265_v63 = vsub.f32 %v218_v32, %v249_v62 }
 0x2c8   :  { %1744 = vpow2.f32 %v270_v61 }
 0x2c9   :  { %v276_v5 = vmul.f32 1.442695, %v265_v63 }
 0x2ca   :  { %v243_v0 = vpop.xlane.xlu1 %242 }
 0x2cb   :  { %v263_v2 = vsub.f32 %v210_v37, %v243_v0 }
 0x2cd   :  { %v272_v6 = vmul.f32 1.442695, %v263_v2 }
 0x2ce   :  { %v258_v7 = vpop.xlane.xlu1 %257 }
 0x2cf   :  { %1746 = vpow2.f32 %v272_v6  ;;  %v268_v8 = vsub.f32 %v231_v43, %v258_v7 }
 0x2d0   :  { %1748 = vpow2.f32 %v276_v5 }
 0x2d1   :  { %v2028_v9 = vpop.eup %1742  ;;  %v282_v10 = vmul.f32 1.442695, %v268_v8 }
 0x2d2   :  { %v1745_v11 = vpop.eup %1744  ;;  %v252_v12 = vpop.xlane.xlu1 %251  ;;  %v292_v15 = vsel %vm237_vm2, %v2028_v9, 0.0 }
 0x2d3   :  { %1750 = vpow2.f32 %v282_v10  ;;  %v266_v16 = vsub.f32 %v223_v47, %v252_v12  ;;  %293 = vadd.xlane.f32.xlu0 %v292_v15  ;;  %v286_v17 = vsel %vm237_vm2, %v1745_v11, 0.0 }
 0x2d4   :  { %287 = vadd.xlane.f32.xlu1 %v286_v17 }
 0x2d5   :  { %v278_v20 = vmul.f32 1.442695, %v266_v16 }
 0x2d6   :  { %v255_v21 = vpop.xlane.xlu1 %254 }
 0x2d7   :  { %1752 = vpow2.f32 %v278_v20  ;;  %v267_v23 = vsub.f32 %v226_v50, %v255_v21 }
 0x2d9   :  { %v1747_v26 = vpop.eup %1746  ;;  %v280_v28 = vmul.f32 1.442695, %v267_v23 }
 0x2da   :  { %v261_v29 = vpop.xlane.xlu1 %260  ;;  %v289_v30 = vsel %vm237_vm2, %v1747_v26, 0.0  ;;  %v1749_v31 = vpop.eup %1748 }
 0x2db   :  { %1754 = vpow2.f32 %v280_v28  ;;  %v269_v32 = vsub.f32 %v234_v53, %v261_v29  ;;  %290 = vadd.xlane.f32.xlu1 %v289_v30  ;;  %v295_v37 = vsel %vm237_vm2, %v1749_v31, 0.0 }
 0x2dd   :  { %v1751_v33 = vpop.eup %1750  ;;  %v284_v34 = vmul.f32 1.442695, %v269_v32 }
 0x2de   :  { %v304_v36 = vsel %vm237_vm2, %v1751_v33, 0.0 }
 0x2df   :  { %1756 = vpow2.f32 %v284_v34  ;;  %305 = vadd.xlane.f32.xlu0 %v304_v36  ;;  %296 = vadd.xlane.f32.xlu1 %v295_v37 }
 0x2e1   :  { %v1753_v38 = vpop.eup %1752 }
 0x2e2   :  { %v298_v40 = vsel %vm237_vm2, %v1753_v38, 0.0 }
 0x2e3   :  { %299 = vadd.xlane.f32.xlu0 %v298_v40 }
 0x2e5   :  { %v1755_v41 = vpop.eup %1754 }
 0x2e6   :  { %v301_v42 = vsel %vm237_vm2, %v1755_v41, 0.0 }
 0x2e7   :  { %302 = vadd.xlane.f32.xlu1 %v301_v42 }
 0x2e9   :  { %v1757_v43 = vpop.eup %1756 }
 0x2ea   :  { %v307_v44 = vsel %vm237_vm2, %v1757_v43, 0.0 }
 0x2eb   :  { %308 = vadd.xlane.f32.xlu1 %v307_v44 }
 0x2f9   :  { %330 = vrot.lane.b32.xlu0 %v1939_v14, %s1849_s1 }
 0x360   :  { %v294_v48 = vpop.xlane.xlu0 %293 }
 0x361   :  { %v288_v47 = vpop.xlane.xlu1 %287 }
 0x362   :  { %1758 = vrcp.f32 %v288_v47  ;;  %v2072_v47 = vld [vmem:[%s2309_s9] sm:$0x3f] }
 0x368   :  { %v291_v50 = vpop.xlane.xlu1 %290 }
 0x369   :  { %1760 = vrcp.f32 %v291_v50 }
 0x36a   :  { %1762 = vrcp.f32 %v294_v48 }
 0x36c   :  { %v297_v51 = vpop.xlane.xlu1 %296  ;;  %v306_v53 = vpop.xlane.xlu0 %305 }
 0x36d   :  { %1764 = vrcp.f32 %v297_v51  ;;  %v1759_v55 = vpop.eup %1758 }
 0x36e   :  { %v318_v58 = vmul.f32 %v1759_v55, %v1745_v11 }
 0x370   :  { %v300_v54 = vpop.xlane.xlu0 %299 }
 0x371   :  { %1766 = vrcp.f32 %v300_v54 }
 0x373   :  { %v1761_v56 = vpop.eup %1760 }
 0x374   :  { %v303_v14 = vpop.xlane.xlu1 %302  ;;  %v331_v57 = vpop.permute.xlu0 %330  ;;  %v319_v59 = vmul.f32 %v1761_v56, %v1747_v26 }
 0x375   :  { %v1763_v60 = vpop.eup %1762  ;;  %1768 = vrcp.f32 %v303_v14  ;;  %1607 = vmatprep.subr.bf16.mxu0 %v331_v57 }
 0x376   :  { %1608 = vmatpush3.bf16.msra.mxu0 %v331_v57  ;;  %v326_v61 = vpack.c.bf16 %v319_v59, %v318_v58  ;;  %1770 = vrcp.f32 %v306_v53  ;;  %v320_v0 = vmul.f32 %v1763_v60, %v2028_v9  ;;  %v1725_v9 = vld [vmem:[%s2305_s5 + $0x8] sm:$0xff]  }
 0x377   :  { %v1765_v62 = vpop.eup %1764  ;;  %1629 = vmatprep.subr.bf16.mxu0 %v1846_v1  ;;  %1619 = vmatprep.subr.bf16.mxu1 %v1725_v9 }
 0x378   :  { %1609 = vmatprep.mubr.msk.bf16.mxu0 %vm237_vm2, %v326_v61  ;;  %v309_v63 = vpop.xlane.xlu1 %308  ;;  %v321_v2 = vmul.f32 %v1765_v62, %v1749_v31  ;;  %1620 = vmatpush3.bf16.msra.mxu1 %v1725_v9 }
 0x379   :  { %1772 = vrcp.f32 %v309_v63  ;;  %1637 = vmatprep.subr.bf16.mxu1 %v1846_v1 }
 0x37a   :  { %v327_v5 = vpack.c.bf16 %v321_v2, %v320_v0 }
 0x37b   :  { %v1767_v6 = vpop.eup %1766 }
 0x37c   :  { %1610 = vmatmul.mubr.msk.bf16.vlgmr.msra.gmra.mrb[0].mxu0 %vm237_vm2, %v327_v5  ;;  %v322_v8 = vmul.f32 %v1767_v6, %v1753_v38 }
 0x37f   :  { %v1769_v7 = vpop.eup %1768 }
 0x380   :  { %v323_v10 = vmul.f32 %v1769_v7, %v1755_v41  ;;  %v1771_v11 = vpop.eup %1770 }
 0x381   :  { %v324_v16 = vmul.f32 %v1771_v11, %v1751_v33 }
 0x382   :  { %v328_v12 = vpack.c.bf16 %v323_v10, %v322_v8 }
 0x383   :  { %v1773_v15 = vpop.eup %1772 }
 0x384   :  { %1613 = vmatprep.mubr.msk.bf16.mxu0 %vm237_vm2, %v328_v12  ;;  %v325_v17 = vmul.f32 %v1773_v15, %v1757_v43  ;;  %v511_v43 = vlaneseq }
 0x386   :  { %v329_v20 = vpack.c.bf16 %v325_v17, %v324_v16  ;;  %v2066_v44 = vshrl.u32 %v511_v43, 7 }
 0x388   :  { %1614 = vmatmul.mubr.msk.bf16.gmra.mrb[4].mxu0 %vm237_vm2, %v329_v20  ;;  %v513_v45 = vsub.s32 0, %v2066_v44 }
 0x389   :  { %1633 = vmatprep.mubr.msk.bf16.mxu0 %vm1847_vm0, %v1846_v1 }
 0x38a   :  { %v514_v48 = vrot.slane %v2072_v47, %v513_v45 }
 0x44f   :  { %v1611_v21 = vpop.f32.mrb[0].mxu0 }
 0x450   :  { %v379_v23 = vpop.f32.mrb[1].mxu0 }
 0x451   :  { %v1612_v26 = vpop.f32.mrb[2].mxu0 }
 0x452   :  { %v411_v28 = vpack.c.bf16 %v1612_v26, %v1611_v21  ;;  %v382_v29 = vpop.f32.mrb[3].mxu0  ;;  %v1728_v26 = vld [vmem:[%s2308_s8] sm:$0xff]  }
 0x453   :  { %v410_v30 = vpack.c.bf16 %v382_v29, %v379_v23  ;;  %v1727_v23 = vld [vmem:[%s2306_s6 + $0x8] sm:$0xff]  }
 0x454   :  { %v415_v32 = vmul.bf16 %v1951_v18, %v411_v28  ;;  %v1729_v28 = vld [vmem:[%s2308_s8 + $0x8] sm:$0xff]  }
 0x455   :  { %v414_v31 = vmul.bf16 %v1937_v13, %v410_v30 }
 0x457   :  { %1621 = vmatprep.mubr.msk.bf16.mxu1 %vm80_vm1, %v414_v31 }
 0x458   :  { %1622 = vmatmul.mubr.msk.bf16.vlgmr.msra.gmra.mrb[12].mxu1 %vm80_vm1, %v415_v32 }
 0x459   :  { %1638 = vmatpush3.bf16.msra.mxu1 %v1728_v26 }
 0x45a   :  { %1639 = vmatprep.subr.bf16.mxu1 %v1846_v1 }
 0x45b   :  { %v1615_v33 = vpop.f32.mrb[4].mxu0 }
 0x45c   :  { %v395_v34 = vpop.f32.mrb[5].mxu0 }
 0x45d   :  { %v1616_v36 = vpop.f32.mrb[6].mxu0  ;;  %1640 = vmatpush3.bf16.msra.mxu1 %v1729_v28 }
 0x45e   :  { %v413_v37 = vpack.c.bf16 %v1616_v36, %v1615_v33  ;;  %v398_v38 = vpop.f32.mrb[7].mxu0  ;;  %1641 = vmatprep.subr.bf16.mxu1 %v1846_v1  ;;  %v554_v36 = vsub.s32 1, %v2066_v44 }
 0x45f   :  { %v412_v40 = vpack.c.bf16 %v398_v38, %v395_v34 }
 0x460   :  { %v417_v42 = vmul.bf16 %v1967_v22, %v413_v37  ;;  %v555_v38 = vrot.slane %v2072_v47, %v554_v36 }
 0x461   :  { %v416_v41 = vmul.bf16 %v1956_v19, %v412_v40  ;;  %v560_v40 = vsub.s32 2, %v2066_v44 }
 0x463   :  { %1625 = vmatprep.mubr.msk.bf16.mxu1 %vm80_vm1, %v416_v41  ;;  %v561_v43 = vrot.slane %v2072_v47, %v560_v40 }
 0x464   :  { %1626 = vmatmul.mubr.msk.bf16.gmra.mrb[16].mxu1 %vm80_vm1, %v417_v42 }
 0x465   :  { %1645 = vmatprep.mubr.msk.bf16.mxu1 %vm1847_vm0, %v1846_v1 }
 0x52b   :  { %v1623_v50 = vpop.f32.mrb[12].mxu1 }
 0x52c   :  { %v480_v51 = vpop.f32.mrb[13].mxu1 }
 0x52d   :  { %v515_v53 = vadd.f32 %v514_v48, %v480_v51  ;;  %v1624_v54 = vpop.f32.mrb[14].mxu1 }
 0x52e   :  { %v483_v55 = vpop.f32.mrb[15].mxu1 }
 0x52f   :  { %v516_v56 = vadd.f32 %v514_v48, %v483_v55  ;;  %v517_v14 = vadd.f32 %v1623_v50, %v515_v53 }
 0x531   :  { %v518_v57 = vadd.f32 %v1624_v54, %v516_v56  ;;  %v1730_v56 = vld [vmem:[%s2308_s8 + $0x10] sm:$0xff]  }
 0x532   :  { %1642 = vmatpush3.bf16.msra.mxu1 %v1730_v56  ;;  %v752_v56 = vsub.s32 5, %v2066_v44 }
 0x533   :  { %1643 = vmatprep.subr.bf16.mxu1 %v1846_v1 }
 0x537   :  { %v1627_v58 = vpop.f32.mrb[16].mxu1 }
 0x538   :  { %v496_v59 = vpop.f32.mrb[17].mxu1 }
 0x539   :  { %v519_v60 = vadd.f32 %v517_v14, %v496_v59  ;;  %v1628_v61 = vpop.f32.mrb[18].mxu1  ;;  %v1731_v14 = vld [vmem:[%s2308_s8 + $0x18] sm:$0xff]  }
 0x53a   :  { %v499_v62 = vpop.f32.mrb[19].mxu1  ;;  %1644 = vmatpush3.bf16.msra.mxu1 %v1731_v14 }
 0x53b   :  { %v521_v63 = vadd.f32 %v1627_v58, %v519_v60  ;;  %v520_v0 = vadd.f32 %v518_v57, %v499_v62  ;;  %v1476_v57 = vld [vmem:[%s2307_s7] ss:$0 sm:$0xff] }
 0x53d   :  { %v522_v2 = vadd.f32 %v1628_v61, %v520_v0  ;;  %v523_v5 = vadd.f32 %v521_v63, %v1920_v3 }
 0x53f   :  { %v525_v6 = vsel %vm80_vm1, %v523_v5, 0.0  ;;  %v524_v7 = vadd.f32 %v522_v2, %v1925_v4  ;;  %v1726_v4 = vld [vmem:[%s2306_s6] sm:$0xff]  }
 0x540   :  { %526 = vadd.xlane.f32.xlu1 %v525_v6  ;;  %1630 = vmatpush3.bf16.msra.mxu0 %v1726_v4  ;;  %v645_v6 = vsub.s32 3, %v2066_v44 }
 0x541   :  { %v528_v8 = vsel %vm80_vm1, %v524_v7, 0.0  ;;  %1631 = vmatprep.subr.bf16.mxu0 %v1846_v1 }
 0x544   :  { %529 = vadd.xlane.f32.xlu1 %v528_v8  ;;  %1632 = vmatpush3.bf16.msra.mxu0 %v1727_v23 }
 0x545   :  { %1649 = vmatprep.subr.bf16.mxu0 %v1846_v1 }
 0x5cd   :  { %v527_v10 = vpop.xlane.xlu1 %526 }
 0x5ce   :  { %v532_v11 = vmul.f32 0.03125, %v527_v10 }
 0x5d0   :  { %v534_v12 = vsub.f32 %v523_v5, %v532_v11 }
 0x5d1   :  { %v530_v15 = vpop.xlane.xlu1 %529 }
 0x5d2   :  { %v533_v16 = vmul.f32 0.03125, %v530_v15  ;;  %v536_v17 = vmul.f32 %v534_v12, %v534_v12 }
 0x5d4   :  { %v535_v20 = vsub.f32 %v524_v7, %v533_v16  ;;  %v538_v9 = vsel %vm80_vm1, %v536_v17, 0.0  ;;  %v646_v7 = vrot.slane %v2072_v47, %v645_v6 }
 0x5d5   :  { %539 = vadd.xlane.f32.xlu1 %v538_v9 }
 0x5d6   :  { %v537_v21 = vmul.f32 %v535_v20, %v535_v20 }
 0x5d8   :  { %v541_v3 = vsel %vm80_vm1, %v537_v21, 0.0 }
 0x5d9   :  { %542 = vadd.xlane.f32.xlu1 %v541_v3 }
 0x662   :  { %v540_v29 = vpop.xlane.xlu1 %539 }
 0x663   :  { %v544_v30 = vmul.f32 0.03125, %v540_v29 }
 0x665   :  { %v546_v31 = vadd.f32 1e-05, %v544_v30 }
 0x666   :  { %v543_v32 = vpop.xlane.xlu1 %542 }
 0x667   :  { %1774 = vrsqrt.f32 %v546_v31  ;;  %v545_v33 = vmul.f32 0.03125, %v543_v32 }
 0x669   :  { %v547_v34 = vadd.f32 1e-05, %v545_v33 }
 0x66b   :  { %1776 = vrsqrt.f32 %v547_v34  ;;  %v1732_v34 = vld [vmem:[%s2303_s3 + $0x10] sm:$0xff]  }
 0x671   :  { %v1775_v37 = vpop.eup %1774 }
 0x672   :  { %v550_v41 = vmul.f32 %v1775_v37, %v534_v12  ;;  %v1733_v37 = vld [vmem:[%s2303_s3 + $0x18] sm:$0xff]  }
 0x674   :  { %v556_v48 = vmul.f32 %v555_v38, %v550_v41 }
 0x675   :  { %v1777_v42 = vpop.eup %1776 }
 0x676   :  { %v551_v50 = vmul.f32 %v1777_v42, %v535_v20  ;;  %v562_v53 = vadd.f32 %v561_v43, %v556_v48 }
 0x678   :  { %v557_v51 = vmul.f32 %v555_v38, %v551_v50 }
 0x67a   :  { %v563_v54 = vadd.f32 %v561_v43, %v557_v51  ;;  %v746_v51 = vsub.s32 4, %v2066_v44 }
 0x67c   :  { %v564_v55 = vpack.c.bf16 %v563_v54, %v562_v53 }
 0x67e   :  { %1634 = vmatmul.mubr.msk.bf16.vlgmr.msra.gmra.mrb[8].mxu0 %vm80_vm1, %v564_v55 }
 0x67f   :  { %1653 = vmatprep.mubr.msk.bf16.mxu0 %vm1847_vm0, %v1846_v1  ;;  %1650 = vmatpush3.bf16.msra.mxu0 %v1732_v34 }
 0x680   :  { %1651 = vmatprep.subr.bf16.mxu0 %v1846_v1 }
 0x683   :  { %1652 = vmatpush3.bf16.msra.mxu0 %v1733_v37 }
 0x751   :  { %v625_v58 = vpop.f32.mrb[8].mxu0 }
 0x752   :  { %v626_v59 = vadd.f32 %v1476_v57, %v625_v58  ;;  %v1635_v60 = vpop.f32.mrb[9].mxu0 }
 0x753   :  { %v628_v61 = vpop.f32.mrb[10].mxu0 }
 0x754   :  { %v629_v62 = vadd.f32 %v1476_v57, %v628_v61  ;;  %v1636_v63 = vpop.f32.mrb[11].mxu0  ;;  %v632_v0 = vmax.f32 %v626_v59, 0.0  ;;  %v753_v59 = vrot.slane %v2072_v47, %v752_v56 }
 0x756   :  { %v633_v2 = vmax.f32 %v629_v62, 0.0 }
 0x758   :  { %v634_v5 = vpack.c.bf16 %v633_v2, %v632_v0  ;;  %v1491_v0 = vld [vmem:[%s2304_s4 + $0x1] ss:$0 sm:$0xff] }
 0x75a   :  { %1646 = vmatmul.mubr.msk.bf16.vlgmr.msra.gmra.mrb[20].mxu1 %vm671_vm3, %v634_v5 }
 0x82d   :  { %v709_v8 = vpop.f32.mrb[20].mxu1 }
 0x82e   :  { %v710_v10 = vadd.f32 %v709_v8, %v646_v7  ;;  %v1647_v11 = vpop.f32.mrb[21].mxu1 }
 0x82f   :  { %v712_v12 = vpop.f32.mrb[22].mxu1 }
 0x830   :  { %v713_v15 = vadd.f32 %v712_v12, %v646_v7  ;;  %v1648_v16 = vpop.f32.mrb[23].mxu1  ;;  %v716_v17 = vadd.f32 %v710_v10, %v562_v53 }
 0x832   :  { %v718_v20 = vsel %vm80_vm1, %v716_v17, 0.0  ;;  %v717_v9 = vadd.f32 %v713_v15, %v563_v54  ;;  %v747_v54 = vrot.slane %v2072_v47, %v746_v51 }
 0x833   :  { %719 = vadd.xlane.f32.xlu1 %v718_v20 }
 0x834   :  { %v721_v21 = vsel %vm80_vm1, %v717_v9, 0.0 }
 0x837   :  { %722 = vadd.xlane.f32.xlu1 %v721_v21 }
 0x8c0   :  { %v720_v3 = vpop.xlane.xlu1 %719 }
 0x8c1   :  { %v724_v4 = vmul.f32 0.03125, %v720_v3 }
 0x8c3   :  { %v726_v23 = vsub.f32 %v716_v17, %v724_v4 }
 0x8c4   :  { %v723_v26 = vpop.xlane.xlu1 %722 }
 0x8c5   :  { %v725_v28 = vmul.f32 0.03125, %v723_v26  ;;  %v728_v29 = vmul.f32 %v726_v23, %v726_v23 }
 0x8c7   :  { %v727_v30 = vsub.f32 %v717_v9, %v725_v28  ;;  %v730_v31 = vsel %vm80_vm1, %v728_v29, 0.0 }
 0x8c8   :  { %731 = vadd.xlane.f32.xlu0 %v730_v31 }
 0x8c9   :  { %v729_v32 = vmul.f32 %v727_v30, %v727_v30 }
 0x8cb   :  { %v733_v33 = vsel %vm80_vm1, %v729_v32, 0.0 }
 0x8cc   :  { %734 = vadd.xlane.f32.xlu1 %v733_v33 }
 0x955   :  { %v732_v38 = vpop.xlane.xlu0 %731 }
 0x956   :  { %v736_v41 = vmul.f32 0.03125, %v732_v38 }
 0x958   :  { %v738_v42 = vadd.f32 1e-05, %v736_v41 }
 0x959   :  { %v735_v43 = vpop.xlane.xlu1 %734 }
 0x95a   :  { %1778 = vrsqrt.f32 %v738_v42  ;;  %v737_v48 = vmul.f32 0.03125, %v735_v43 }
 0x95c   :  { %v739_v50 = vadd.f32 1e-05, %v737_v48 }
 0x95e   :  { %1780 = vrsqrt.f32 %v739_v50 }
 0x964   :  { %v1779_v53 = vpop.eup %1778 }
 0x965   :  { %v742_v55 = vmul.f32 %v1779_v53, %v726_v23 }
 0x967   :  { %v748_v57 = vmul.f32 %v747_v54, %v742_v55 }
 0x968   :  { %v1781_v14 = vpop.eup %1780 }
 0x969   :  { %v743_v58 = vmul.f32 %v1781_v14, %v727_v30  ;;  %v2144_v61 = vadd.f32 %v753_v59, %v748_v57 }
 0x96b   :  { %v749_v60 = vmul.f32 %v747_v54, %v743_v58 }
 0x96d   :  { %v2146_v62 = vadd.f32 %v753_v59, %v749_v60 }
 0x96f   :  { %v758_v63 = vpack.c.bf16 %v2146_v62, %v2144_v61 }
 0x971   :  { %1654 = vmatmul.mubr.msk.bf16.vlgmr.msra.gmra.mrb[12].mxu0 %vm80_vm1, %v758_v63 }
 0xa44   :  { %v821_v2 = vpop.f32.mrb[12].mxu0 }
 0xa45   :  { %v1655_v5 = vpop.f32.mrb[13].mxu0  ;;  %v822_v8 = vadd.f32 %v1491_v0, %v821_v2 }
 0xa46   :  { %v824_v7 = vpop.f32.mrb[14].mxu0 }
 0xa47   :  { %v825_v10 = vadd.f32 %v1491_v0, %v824_v7  ;;  %v1656_v47 = vpop.f32.mrb[15].mxu0 }
 0xa49   :  { %v2154_v11 = vpack.c.bf16 %v825_v10, %v822_v8 }
 0xa4b   :  { %834 = vrot.lane.b32.xlu1 %v2154_v11, %s1848_s24  ;;  %v829_v12 = vmul.bf16 %v1937_v13, %v2154_v11  ;;  %v830_v17 = vmul.bf16 %v1951_v18, %v2154_v11  ;;  %v831_v20 = vmul.bf16 %v1956_v19, %v2154_v11  ;;  %v832_v9 = vmul.bf16 %v1967_v22, %v2154_v11 }
 0xa4d   :  { %1659 = vmatprep.mubr.msk.bf16.mxu0 %vm80_vm1, %v829_v12 }
 0xabd   :  { %v835_v15 = vpop.permute.xlu1 %834 }
 0xabe   :  { %v849_v16 = vsel %vm80_vm1, %v835_v15, 0  ;;  %1710 = vmatprep.subr.msk.bf16.mxu0 %vm80_vm1, %v835_v15 }
 0xabf   :  { %1658 = vmatpush3.bf16.xpose.msra.mxu0 %v849_v16 }
 0xac6   :  { %1660 = vmatmul.mubr.msk.bf16.vlgmr.msra.gmra.mrb[16].mxu0 %vm80_vm1, %v830_v17 }
 0xac7   :  { %1663 = vmatprep.mubr.msk.bf16.mxu0 %vm80_vm1, %v831_v20 }
 0xace   :  { %1664 = vmatmul.mubr.msk.bf16.gmra.mrb[20].mxu0 %vm80_vm1, %v832_v9 }
 0xb99   :  { %v1661_v21 = vpop.f32.mrb[16].mxu0 }
 0xb9a   :  { %v894_v3 = vadd.f32 %v1661_v21, %v1975_v24  ;;  %v885_v4 = vpop.f32.mrb[17].mxu0 }
 0xb9b   :  { %v886_v23 = vadd.f32 %v885_v4, %v1980_v25  ;;  %v1662_v26 = vpop.f32.mrb[18].mxu0 }
 0xb9c   :  { %v897_v28 = vadd.f32 %v1662_v26, %v1985_v27  ;;  %v888_v29 = vpop.f32.mrb[19].mxu0  ;;  %v922_v30 = vsel %vm237_vm2, %v894_v3, -inf }
 0xb9d   :  { %923 = vmax.xlane.f32.xlu0 %v922_v30  ;;  %v916_v31 = vsel %vm237_vm2, %v886_v23, -inf  ;;  %v889_v32 = vadd.f32 %v888_v29, %v1994_v35 }
 0xb9e   :  { %917 = vmax.xlane.f32.xlu1 %v916_v31  ;;  %v925_v33 = vsel %vm237_vm2, %v897_v28, -inf }
 0xb9f   :  { %v919_v27 = vsel %vm237_vm2, %v889_v32, -inf }
 0xba1   :  { %926 = vmax.xlane.f32.xlu0 %v925_v33  ;;  %v1665_v34 = vpop.f32.mrb[20].mxu0 }
 0xba2   :  { %v901_v24 = vpop.f32.mrb[21].mxu0  ;;  %v910_v25 = vadd.f32 %v1665_v34, %v2002_v39 }
 0xba3   :  { %v1666_v37 = vpop.f32.mrb[22].mxu0  ;;  %v902_v41 = vadd.f32 %v901_v24, %v2009_v46 }
 0xba4   :  { %v904_v38 = vpop.f32.mrb[23].mxu0  ;;  %v934_v42 = vsel %vm237_vm2, %v910_v25, -inf  ;;  %v913_v48 = vadd.f32 %v1666_v37, %v2023_v52 }
 0xba5   :  { %920 = vmax.xlane.f32.xlu0 %v919_v27  ;;  %v905_v43 = vadd.f32 %v904_v38, %v2016_v49  ;;  %v928_v35 = vsel %vm237_vm2, %v902_v41, -inf  ;;  %v1734_v38 = vld [vmem:[%s2305_s5 + $0x10] sm:$0xff]  }
 0xba6   :  { %v937_v39 = vsel %vm237_vm2, %v913_v48, -inf  ;;  %1677 = vmatprep.subr.bf16.mxu0 %v1734_v38 }
 0xba7   :  { %v931_v50 = vsel %vm237_vm2, %v905_v43, -inf  ;;  %1678 = vmatpush3.bf16.msra.mxu0 %v1734_v38 }
 0xba9   :  { %935 = vmax.xlane.f32.xlu0 %v934_v42 }
 0xbad   :  { %929 = vmax.xlane.f32.xlu0 %v928_v35 }
 0xbb1   :  { %932 = vmax.xlane.f32.xlu0 %v931_v50 }
 0xbb5   :  { %938 = vmax.xlane.f32.xlu0 %v937_v39 }
 0xc2a   :  { %v924_v53 = vpop.xlane.xlu0 %923 }
 0xc2b   :  { %v942_v54 = vsub.f32 %v894_v3, %v924_v53  ;;  %v918_v55 = vpop.xlane.xlu1 %917 }
 0xc2c   :  { %v940_v46 = vsub.f32 %v886_v23, %v918_v55 }
 0xc2d   :  { %v952_v14 = vmul.f32 1.442695, %v942_v54 }
 0xc2e   :  { %v948_v57 = vmul.f32 1.442695, %v940_v46  ;;  %v927_v58 = vpop.xlane.xlu0 %926 }
 0xc2f   :  { %1782 = vpow2.f32 %v952_v14  ;;  %v943_v49 = vsub.f32 %v897_v28, %v927_v58 }
 0xc30   :  { %1784 = vpow2.f32 %v948_v57 }
 0xc31   :  { %v954_v63 = vmul.f32 1.442695, %v943_v49 }
 0xc32   :  { %v921_v59 = vpop.xlane.xlu0 %920 }
 0xc33   :  { %v941_v60 = vsub.f32 %v889_v32, %v921_v59 }
 0xc35   :  { %v950_v52 = vmul.f32 1.442695, %v941_v60 }
 0xc36   :  { %v936_v0 = vpop.xlane.xlu0 %935 }
 0xc37   :  { %1786 = vpow2.f32 %v950_v52  ;;  %v946_v2 = vsub.f32 %v910_v25, %v936_v0 }
 0xc38   :  { %1788 = vpow2.f32 %v954_v63 }
 0xc39   :  { %v2188_v5 = vpop.eup %1782  ;;  %v960_v7 = vmul.f32 1.442695, %v946_v2 }
 0xc3a   :  { %v930_v8 = vpop.xlane.xlu0 %929  ;;  %v970_v10 = vsel %vm237_vm2, %v2188_v5, 0.0  ;;  %v1785_v47 = vpop.eup %1784 }
 0xc3b   :  { %1790 = vpow2.f32 %v960_v7  ;;  %v944_v12 = vsub.f32 %v902_v41, %v930_v8  ;;  %971 = vadd.xlane.f32.xlu0 %v970_v10  ;;  %v964_v17 = vsel %vm237_vm2, %v1785_v47, 0.0 }
 0xc3d   :  { %v956_v15 = vmul.f32 1.442695, %v944_v12 }
 0xc3e   :  { %v933_v16 = vpop.xlane.xlu0 %932 }
 0xc3f   :  { %1792 = vpow2.f32 %v956_v15  ;;  %v945_v20 = vsub.f32 %v905_v43, %v933_v16  ;;  %965 = vadd.xlane.f32.xlu0 %v964_v17 }
 0xc41   :  { %v1787_v9 = vpop.eup %1786  ;;  %v958_v21 = vmul.f32 1.442695, %v945_v20 }
 0xc42   :  { %v939_v3 = vpop.xlane.xlu0 %938  ;;  %v967_v4 = vsel %vm237_vm2, %v1787_v9, 0.0  ;;  %v1789_v23 = vpop.eup %1788 }
 0xc43   :  { %1794 = vpow2.f32 %v958_v21  ;;  %v947_v26 = vsub.f32 %v913_v48, %v939_v3  ;;  %968 = vadd.xlane.f32.xlu1 %v967_v4  ;;  %v973_v30 = vsel %vm237_vm2, %v1789_v23, 0.0 }
 0xc45   :  { %v1791_v28 = vpop.eup %1790  ;;  %v962_v29 = vmul.f32 1.442695, %v947_v26 }
 0xc46   :  { %v982_v31 = vsel %vm237_vm2, %v1791_v28, 0.0 }
 0xc47   :  { %1796 = vpow2.f32 %v962_v29  ;;  %974 = vadd.xlane.f32.xlu1 %v973_v30  ;;  %983 = vadd.xlane.f32.xlu0 %v982_v31 }
 0xc49   :  { %v1793_v32 = vpop.eup %1792 }
 0xc4a   :  { %v976_v33 = vsel %vm237_vm2, %v1793_v32, 0.0 }
 0xc4b   :  { %977 = vadd.xlane.f32.xlu0 %v976_v33 }
 0xc4d   :  { %v1795_v34 = vpop.eup %1794 }
 0xc4e   :  { %v979_v24 = vsel %vm237_vm2, %v1795_v34, 0.0 }
 0xc4f   :  { %980 = vadd.xlane.f32.xlu1 %v979_v24 }
 0xc51   :  { %v1797_v37 = vpop.eup %1796 }
 0xc52   :  { %v985_v25 = vsel %vm237_vm2, %v1797_v37, 0.0 }
 0xc53   :  { %986 = vadd.xlane.f32.xlu1 %v985_v25 }
 0xc61   :  { %1008 = vrot.lane.b32.xlu0 %v2154_v11, %s1849_s1 }
 0xcc8   :  { %v972_v27 = vpop.xlane.xlu0 %971 }
 0xccc   :  { %v966_v41 = vpop.xlane.xlu0 %965 }
 0xccd   :  { %1798 = vrcp.f32 %v966_v41 }
 0xcd0   :  { %v969_v42 = vpop.xlane.xlu1 %968 }
 0xcd1   :  { %1800 = vrcp.f32 %v969_v42 }
 0xcd2   :  { %1802 = vrcp.f32 %v972_v27 }
 0xcd4   :  { %v984_v43 = vpop.xlane.xlu0 %983  ;;  %v975_v35 = vpop.xlane.xlu1 %974 }
 0xcd5   :  { %1804 = vrcp.f32 %v975_v35 }
 0xcd7   :  { %v1799_v50 = vpop.eup %1798 }
 0xcd8   :  { %v978_v48 = vpop.xlane.xlu0 %977  ;;  %v996_v54 = vmul.f32 %v1799_v50, %v1785_v47 }
 0xcd9   :  { %1806 = vrcp.f32 %v978_v48 }
 0xcdb   :  { %v1801_v39 = vpop.eup %1800 }
 0xcdc   :  { %v1009_v11 = vpop.permute.xlu0 %1008  ;;  %v981_v53 = vpop.xlane.xlu1 %980  ;;  %v997_v55 = vmul.f32 %v1801_v39, %v1787_v9 }
 0xcdd   :  { %1808 = vrcp.f32 %v981_v53  ;;  %1667 = vmatprep.subr.bf16.mxu1 %v1009_v11  ;;  %v1803_v46 = vpop.eup %1802 }
 0xcde   :  { %1668 = vmatpush3.bf16.msra.mxu1 %v1009_v11  ;;  %v1004_v14 = vpack.c.bf16 %v997_v55, %v996_v54  ;;  %1810 = vrcp.f32 %v984_v43  ;;  %v998_v49 = vmul.f32 %v1803_v46, %v2188_v5  ;;  %v1735_v5 = vld [vmem:[%s2305_s5 + $0x18] sm:$0xff]  }
 0xcdf   :  { %1689 = vmatprep.subr.bf16.mxu1 %v1846_v1  ;;  %v1805_v57 = vpop.eup %1804  ;;  %1679 = vmatprep.subr.bf16.mxu0 %v1735_v5 }
 0xce0   :  { %1669 = vmatprep.mubr.msk.bf16.mxu1 %vm237_vm2, %v1004_v14  ;;  %v987_v58 = vpop.xlane.xlu1 %986  ;;  %v999_v59 = vmul.f32 %v1805_v57, %v1789_v23  ;;  %1680 = vmatpush3.bf16.msra.mxu0 %v1735_v5 }
 0xce1   :  { %1812 = vrcp.f32 %v987_v58  ;;  %1697 = vmatprep.subr.bf16.mxu0 %v1846_v1 }
 0xce2   :  { %v1005_v60 = vpack.c.bf16 %v999_v59, %v998_v49 }
 0xce3   :  { %v1807_v63 = vpop.eup %1806 }
 0xce4   :  { %1670 = vmatmul.mubr.msk.bf16.vlgmr.msra.gmra.mrb[24].mxu1 %vm237_vm2, %v1005_v60  ;;  %v1000_v0 = vmul.f32 %v1807_v63, %v1793_v32 }
 0xce7   :  { %v1809_v52 = vpop.eup %1808 }
 0xce8   :  { %v1001_v2 = vmul.f32 %v1809_v52, %v1795_v34  ;;  %v1811_v7 = vpop.eup %1810 }
 0xce9   :  { %v1002_v47 = vmul.f32 %v1811_v7, %v1791_v28  ;;  %v1738_v7 = vld [vmem:[%s2308_s8 + $0x20] sm:$0xff]  }
 0xcea   :  { %v1006_v8 = vpack.c.bf16 %v1001_v2, %v1000_v0  ;;  %v1737_v2 = vld [vmem:[%s2306_s6 + $0x18] sm:$0xff]  }
 0xceb   :  { %v1813_v10 = vpop.eup %1812 }
 0xcec   :  { %1673 = vmatprep.mubr.msk.bf16.mxu1 %vm237_vm2, %v1006_v8  ;;  %v1003_v12 = vmul.f32 %v1813_v10, %v1797_v37  ;;  %v1739_v8 = vld [vmem:[%s2308_s8 + $0x28] sm:$0xff]  }
 0xcee   :  { %v1007_v15 = vpack.c.bf16 %v1003_v12, %v1002_v47 }
 0xcf0   :  { %1674 = vmatmul.mubr.msk.bf16.gmra.mrb[28].mxu1 %vm237_vm2, %v1007_v15 }
 0xcf1   :  { %1693 = vmatprep.mubr.msk.bf16.mxu1 %vm1847_vm0, %v1846_v1 }
 0xdb7   :  { %v1671_v16 = vpop.f32.mrb[24].mxu1 }
 0xdb8   :  { %v1057_v17 = vpop.f32.mrb[25].mxu1 }
 0xdb9   :  { %v1672_v20 = vpop.f32.mrb[26].mxu1 }
 0xdba   :  { %v1089_v9 = vpack.c.bf16 %v1672_v20, %v1671_v16  ;;  %v1060_v21 = vpop.f32.mrb[27].mxu1 }
 0xdbb   :  { %v1088_v3 = vpack.c.bf16 %v1060_v21, %v1057_v17 }
 0xdbc   :  { %v1093_v23 = vmul.bf16 %v1951_v18, %v1089_v9 }
 0xdbd   :  { %v1092_v4 = vmul.bf16 %v1937_v13, %v1088_v3  ;;  %v2229_v13 = vld [vmem:[%s2309_s9 + $0x8] sm:$0x3f] }
 0xdbe   :  { %v1193_v18 = vrot.slane %v2229_v13, %v513_v45  ;;  %v1233_v20 = vrot.slane %v2229_v13, %v554_v36  ;;  %v1239_v3 = vrot.slane %v2229_v13, %v560_v40  ;;  %v1741_v36 = vld [vmem:[%s2308_s8 + $0x38] sm:$0xff]   ;;  %v1518_v40 = vld [vmem:[%s2307_s7 + $0x1] ss:$0 sm:$0xff]  ;;  %s1850_s7 = smov [#allocation2]  }
 0xdbf   :  { %1681 = vmatprep.mubr.msk.bf16.mxu0 %vm80_vm1, %v1092_v4 }
 0xdc0   :  { %1682 = vmatmul.mubr.msk.bf16.vlgmr.msra.gmra.mrb[24].mxu0 %vm80_vm1, %v1093_v23 }
 0xdc1   :  { %1698 = vmatpush3.bf16.msra.mxu0 %v1738_v7 }
 0xdc2   :  { %1699 = vmatprep.subr.bf16.mxu0 %v1846_v1 }
 0xdc3   :  { %v1675_v26 = vpop.f32.mrb[28].mxu1 }
 0xdc4   :  { %v1073_v28 = vpop.f32.mrb[29].mxu1 }
 0xdc5   :  { %v1676_v29 = vpop.f32.mrb[30].mxu1  ;;  %1700 = vmatpush3.bf16.msra.mxu0 %v1739_v8  ;;  %v1433_v8 = vrot.slane %v2229_v13, %v752_v56 }
 0xdc6   :  { %v1091_v30 = vpack.c.bf16 %v1676_v29, %v1675_v26  ;;  %v1076_v31 = vpop.f32.mrb[31].mxu1  ;;  %1701 = vmatprep.subr.bf16.mxu0 %v1846_v1 }
 0xdc7   :  { %v1090_v32 = vpack.c.bf16 %v1076_v31, %v1073_v28  ;;  %v1740_v31 = vld [vmem:[%s2308_s8 + $0x30] sm:$0xff]   ;;  %s1443_s8 = sshll.u32 %s1850_s7, 4  ;;  %s1444_s8 = int_to_ptr.vmem [resolvable:$true] %s1443_s8 }
 0xdc8   :  { %v1095_v34 = vmul.bf16 %v1967_v22, %v1091_v30  ;;  %s1822_s0 = scalar_lea.vmem %s1444_s8, 256  ;;  %p1827_p1 = scmp.lt.s32.totalorder %s1444_s8, %s1444_s8 }
 0xdc9   :  { %v1094_v33 = vmul.bf16 %v1956_v19, %v1090_v32  ;;  %1702 = vmatpush3.bf16.msra.mxu0 %v1740_v31  ;;  %p1823_p0 = scmp.ne.s32.totalorder %s1444_s8, %s1822_s0  ;;  %p1828_p2 = scmp.lt.s32.totalorder %s1822_s0, %s1822_s0 }
 0xdca   :  { %1703 = vmatprep.subr.bf16.mxu0 %v1846_v1 }
 0xdcb   :  { %1685 = vmatprep.mubr.msk.bf16.mxu0 %vm80_vm1, %v1094_v33  ;;  %p1829_p3 = por %p1828_p2, %p1827_p1 }
 0xdcc   :  { %1686 = vmatmul.mubr.msk.bf16.gmra.mrb[28].mxu0 %vm80_vm1, %v1095_v34 }
 0xdcd   :  { %1705 = vmatprep.mubr.msk.bf16.mxu0 %vm1847_vm0, %v1846_v1  ;;  %1704 = vmatpush3.bf16.msra.mxu0 %v1741_v36  ;;  %p1830_p4 = pnand %p1829_p3, %p1823_p0 }
 0xe93   :  { %v1683_v24 = vpop.f32.mrb[24].mxu0 }
 0xe94   :  { %v1159_v19 = vpop.f32.mrb[25].mxu0 }
 0xe95   :  { %v1194_v37 = vadd.f32 %v1193_v18, %v1159_v19  ;;  %v1684_v22 = vpop.f32.mrb[26].mxu0 }
 0xe96   :  { %v1162_v25 = vpop.f32.mrb[27].mxu0 }
 0xe97   :  { %v1195_v38 = vadd.f32 %v1193_v18, %v1162_v25  ;;  %v1196_v27 = vadd.f32 %v1683_v24, %v1194_v37 }
 0xe99   :  { %v1197_v41 = vadd.f32 %v1684_v22, %v1195_v38 }
 0xe9f   :  { %v1687_v42 = vpop.f32.mrb[28].mxu0 }
 0xea0   :  { %v1175_v43 = vpop.f32.mrb[29].mxu0 }
 0xea1   :  { %v1198_v35 = vadd.f32 %v1196_v27, %v1175_v43  ;;  %v1688_v48 = vpop.f32.mrb[30].mxu0 }
 0xea2   :  { %v1178_v50 = vpop.f32.mrb[31].mxu0 }
 0xea3   :  { %v1200_v39 = vadd.f32 %v1687_v42, %v1198_v35  ;;  %v1199_v11 = vadd.f32 %v1197_v41, %v1178_v50 }
 0xea5   :  { %v1201_v53 = vadd.f32 %v1688_v48, %v1199_v11  ;;  %v1202_v54 = vadd.f32 %v1200_v39, %v2144_v61 }
 0xea7   :  { %v1204_v45 = vsel %vm80_vm1, %v1202_v54, 0.0  ;;  %v1203_v55 = vadd.f32 %v1201_v53, %v2146_v62  ;;  %v1736_v62 = vld [vmem:[%s2306_s6 + $0x10] sm:$0xff]  }
 0xea8   :  { %1205 = vadd.xlane.f32.xlu1 %v1204_v45  ;;  %1690 = vmatpush3.bf16.msra.mxu1 %v1736_v62  ;;  %v1427_v62 = vrot.slane %v2229_v13, %v746_v51 }
 0xea9   :  { %v1207_v46 = vsel %vm80_vm1, %v1203_v55, 0.0  ;;  %1691 = vmatprep.subr.bf16.mxu1 %v1846_v1  ;;  %v1327_v1 = vrot.slane %v2229_v13, %v645_v6 }
 0xeac   :  { %1208 = vadd.xlane.f32.xlu1 %v1207_v46  ;;  %1692 = vmatpush3.bf16.msra.mxu1 %v1737_v2 }
 0xf35   :  { %v1206_v14 = vpop.xlane.xlu1 %1205 }
 0xf36   :  { %v1210_v57 = vmul.f32 0.03125, %v1206_v14 }
 0xf38   :  { %v1212_v58 = vsub.f32 %v1202_v54, %v1210_v57 }
 0xf39   :  { %v1209_v49 = vpop.xlane.xlu1 %1208 }
 0xf3a   :  { %v1211_v59 = vmul.f32 0.03125, %v1209_v49  ;;  %v1214_v60 = vmul.f32 %v1212_v58, %v1212_v58 }
 0xf3c   :  { %v1213_v63 = vsub.f32 %v1203_v55, %v1211_v59  ;;  %v1216_v52 = vsel %vm80_vm1, %v1214_v60, 0.0 }
 0xf3d   :  { %1217 = vadd.xlane.f32.xlu1 %v1216_v52 }
 0xf3e   :  { %v1215_v0 = vmul.f32 %v1213_v63, %v1213_v63 }
 0xf40   :  { %v1219_v61 = vsel %vm80_vm1, %v1215_v0, 0.0 }
 0xf41   :  { %1220 = vadd.xlane.f32.xlu1 %v1219_v61 }
 0xfca   :  { %v1218_v10 = vpop.xlane.xlu1 %1217 }
 0xfcb   :  { %v1222_v47 = vmul.f32 0.03125, %v1218_v10 }
 0xfcd   :  { %v1224_v12 = vadd.f32 1e-05, %v1222_v47 }
 0xfce   :  { %v1221_v15 = vpop.xlane.xlu1 %1220 }
 0xfcf   :  { %1814 = vrsqrt.f32 %v1224_v12  ;;  %v1223_v5 = vmul.f32 0.03125, %v1221_v15 }
 0xfd1   :  { %v1225_v16 = vadd.f32 1e-05, %v1223_v5 }
 0xfd3   :  { %1816 = vrsqrt.f32 %v1225_v16 }
 0xfd9   :  { %v1815_v17 = vpop.eup %1814 }
 0xfda   :  { %v1228_v9 = vmul.f32 %v1815_v17, %v1212_v58 }
 0xfdc   :  { %v1234_v4 = vmul.f32 %v1233_v20, %v1228_v9 }
 0xfdd   :  { %v1817_v21 = vpop.eup %1816 }
 0xfde   :  { %v1229_v23 = vmul.f32 %v1817_v21, %v1213_v63  ;;  %v1240_v28 = vadd.f32 %v1239_v3, %v1234_v4 }
 0xfe0   :  { %v1235_v26 = vmul.f32 %v1233_v20, %v1229_v23 }
 0xfe2   :  { %v1241_v29 = vadd.f32 %v1239_v3, %v1235_v26 }
 0xfe4   :  { %v1242_v30 = vpack.c.bf16 %v1241_v29, %v1240_v28 }
 0xfe6   :  { %1694 = vmatmul.mubr.msk.bf16.vlgmr.msra.gmra.mrb[32].mxu1 %vm80_vm1, %v1242_v30 }
0x10b9   :  { %v1305_v32 = vpop.f32.mrb[32].mxu1 }
0x10ba   :  { %v1306_v33 = vadd.f32 %v1518_v40, %v1305_v32  ;;  %v1695_v34 = vpop.f32.mrb[33].mxu1 }
0x10bb   :  { %v1308_v18 = vpop.f32.mrb[34].mxu1 }
0x10bc   :  { %v1309_v24 = vadd.f32 %v1518_v40, %v1308_v18  ;;  %v1696_v19 = vpop.f32.mrb[35].mxu1  ;;  %v1312_v37 = vmax.f32 %v1306_v33, 0.0 }
0x10be   :  { %v1313_v22 = vmax.f32 %v1309_v24, 0.0 }
0x10c0   :  { %v1314_v25 = vpack.c.bf16 %v1313_v22, %v1312_v37 }
0x10c2   :  { %1706 = vmatmul.mubr.msk.bf16.vlgmr.msra.gmra.mrb[32].mxu0 %vm671_vm3, %v1314_v25 }
0x1195   :  { %v1389_v38 = vpop.f32.mrb[32].mxu0 }
0x1196   :  { %v1390_v27 = vadd.f32 %v1389_v38, %v1327_v1  ;;  %v1707_v41 = vpop.f32.mrb[33].mxu0 }
0x1197   :  { %v1392_v42 = vpop.f32.mrb[34].mxu0 }
0x1198   :  { %v1393_v43 = vadd.f32 %v1392_v42, %v1327_v1  ;;  %v1708_v35 = vpop.f32.mrb[35].mxu0  ;;  %v1396_v48 = vadd.f32 %v1390_v27, %v1240_v28 }
0x119a   :  { %v1398_v50 = vsel %vm80_vm1, %v1396_v48, 0.0  ;;  %v1397_v39 = vadd.f32 %v1393_v43, %v1241_v29 }
0x119b   :  { %1399 = vadd.xlane.f32.xlu1 %v1398_v50 }
0x119c   :  { %v1401_v11 = vsel %vm80_vm1, %v1397_v39, 0.0 }
0x119f   :  { %1402 = vadd.xlane.f32.xlu1 %v1401_v11 }
0x1228   :  { %v1400_v53 = vpop.xlane.xlu1 %1399 }
0x1229   :  { %v1404_v54 = vmul.f32 0.03125, %v1400_v53 }
0x122b   :  { %v1406_v45 = vsub.f32 %v1396_v48, %v1404_v54 }
0x122c   :  { %v1403_v55 = vpop.xlane.xlu1 %1402 }
0x122d   :  { %v1405_v46 = vmul.f32 0.03125, %v1403_v55  ;;  %v1408_v6 = vmul.f32 %v1406_v45, %v1406_v45 }
0x122f   :  { %v1407_v14 = vsub.f32 %v1397_v39, %v1405_v46  ;;  %v1410_v57 = vsel %vm80_vm1, %v1408_v6, 0.0 }
0x1230   :  { %1411 = vadd.xlane.f32.xlu0 %v1410_v57 }
0x1231   :  { %v1409_v58 = vmul.f32 %v1407_v14, %v1407_v14 }
0x1233   :  { %v1413_v49 = vsel %vm80_vm1, %v1409_v58, 0.0 }
0x1234   :  { %1414 = vadd.xlane.f32.xlu1 %v1413_v49 }
0x12bd   :  { %v1412_v59 = vpop.xlane.xlu0 %1411 }
0x12be   :  { %v1416_v60 = vmul.f32 0.03125, %v1412_v59 }
0x12c0   :  { %v1418_v63 = vadd.f32 1e-05, %v1416_v60 }
0x12c1   :  { %v1415_v52 = vpop.xlane.xlu1 %1414 }
0x12c2   :  { %1818 = vrsqrt.f32 %v1418_v63  ;;  %v1417_v0 = vmul.f32 0.03125, %v1415_v52 }
0x12c4   :  { %v1419_v61 = vadd.f32 1e-05, %v1417_v0 }
0x12c6   :  { %1820 = vrsqrt.f32 %v1419_v61 }
0x12cc   :  { %v1819_v2 = vpop.eup %1818 }
0x12cd   :  { %v1422_v7 = vmul.f32 %v1819_v2, %v1406_v45 }
0x12cf   :  { %v1428_v10 = vmul.f32 %v1427_v62, %v1422_v7 }
0x12d0   :  { %v1821_v47 = vpop.eup %1820 }
0x12d1   :  { %v1423_v12 = vmul.f32 %v1821_v47, %v1407_v14  ;;  %v1434_v15 = vadd.f32 %v1433_v8, %v1428_v10 }
0x12d3   :  { %v1429_v5 = vmul.f32 %v1427_v62, %v1423_v12  ;;  %1436 = vst.msk [vmem:[#allocation2] sm:$0xff] %vm80_vm1, %v1434_v15 }
0x12d5   :  { %v1435_v16 = vadd.f32 %v1433_v8, %v1429_v5 }
0x12d7   :  { %1437 = vst.msk [vmem:[#allocation2 + $0x8] sm:$0xff] %vm80_vm1, %v1435_v16 }
0x12d8   :  { %1833 = shalt.err (!%p1830_p4)
}
0x12d9   :  { %s1834_s26 = scalar_lea.hbm %s2310_s10, 256 }
0x12da   :  { %p1835_p5 = scmp.ne.s32.totalorder %s2310_s10, %s1834_s26  ;;  %p1838_p6 = scmp.lt.u32.totalorder %s1834_s26, %s2310_s10 }
0x12dc   :  { %p1840_p7 = pnand %p1838_p6, %p1835_p5 }
0x12de   :  { %1843 = shalt.err (!%p1840_p7)
}
0x12df   :  { %s1851_s4 = smov 128   ;;  %s1852_s24 = smov 8  }
0x12e0   :  { %1449 = dma.vmem_to_hbm [thread:$0]  %s1444_s8, 256, %s2310_s10, [#allocation3], %s1851_s4, %s1851_s4, %s1852_s24  }
0x12e1   :  { %1844 = dma.done.wait [#allocation3], 256  }
0x12e2   :  { %1845 = vsyncadd [#allocation3], 4294967040 }
0x12e3   :  { %1453 = vsyncpa [#allocation3], 1 }

</bundles_post_ra>
